<compile_context>
chip_gen: v5e
topology: v5e:2x2
jax: 0.10.0
libtpu: 0.0.40
codegen_flags: <defaults>
</compile_context>

<pallas_src>
import functools

import jax
import jax.numpy as jnp
from jax.experimental import pallas as pl
from jax.experimental.pallas import tpu as pltpu


def _round_up(x, m):
    return (x + m - 1) // m * m


def _pick_h_tile(H, target=16):
    # Prefer a multiple of 8 that divides H (sublane-aligned row groups).
    for t in range(min(H, target), 0, -1):
        if H % t == 0 and t % 8 == 0:
            return t
    for t in range(min(H, target), 0, -1):
        if H % t == 0:
            return t
    return 1


def _pick_q_tile(TN, target=256):
    # N=256 already saturates the MXU on v6e/v7x (128 on v5e); larger only
    # inflates the f32 accumulator and VMEM pressure.
    if TN <= 128 or TN % 128 != 0:
        return TN
    t = min(TN, target)
    t -= t % 128
    while TN % t != 0:
        t -= 128
    return max(t, 128)


def _conv3x3_d2s_kernel(x_ref, w_ref, b_ref, o_ref, *, TH, Wp, Cin, TNB):
    """One output tile: TH conv rows x Wp (padded) cols x TNB conv channels.

    x_ref: (1, 1, TH+3, Wp, Cin)  halo'd input tile (1 top + 2 bottom halo rows)
    w_ref: (1, 3, 3, Cin, TNB)    weight slice for this (p1, channel-tile)
    b_ref: (1, 1, TNB)            f32 bias slice
    o_ref: (1, TH, 1, Wp, TNB)    fused depth_to_space output block (Wp-wide)
    """
    M = TH * Wp                 # accumulator rows (flat index h*Wp + w)
    Ms = (TH + 2) * Wp          # rows covering dh*Wp + M for dh in 0..2

    # Row-flattened activation slab; Wp % 8 == 0 so the merge is layout-preserving.
    x_flat = x_ref[...].reshape((TH + 3) * Wp, Cin)
    # kw shift applied once to the narrow (Cin, compute-dtype) LHS:
    # dw=0 is free, dw=1,2 cost one sublane-shift copy each per tile.
    x_sh = [x_flat[dw:dw + Ms] for dw in range(3)]

    acc = None
    for dw in range(3):
        for dh in range(3):
            lhs = x_sh[dw][dh * Wp:dh * Wp + M]       # sublane-aligned slice
            p = jnp.dot(lhs, w_ref[0, dh, dw],
                        preferred_element_type=jnp.float32)
            acc = p if acc is None else acc + p       # MXU-accumulate chain
    acc = acc + b_ref[0]                              # (1, TNB) f32 broadcast

    # Wp % 8 == 0 -> layout-preserving split; width crop happens in the XLA
    # output pass, so this is a plain aligned, lane-dense full-tile store.
    o_ref[...] = acc.reshape(1, TH, 1, Wp, TNB).astype(o_ref.dtype)


def upsampler_forward(x_nchw, weight_oihw, bias, *, h_tile=None, q_tile=None,
                      compute_dtype=jnp.bfloat16):
    """Upsampler.forward: depth_to_space(conv2d(x, 3x3, pad=1), block=2).

    x_nchw: (B, C, H, W); weight_oihw: (4C, C, 3, 3); bias: (4C,)
    returns (B, C, 2H, 2W) in x's dtype.
    """
    B, Cin, H, W = x_nchw.shape
    Cout = weight_oihw.shape[0]
    assert weight_oihw.shape == (Cout, Cin, 3, 3)
    assert bias.shape == (Cout,)
    assert Cout % 4 == 0, "depth_to_space(2) needs Cout % 4 == 0"
    Cpr = Cout // 4                     # channels after depth_to_space
    TN = 2 * Cpr                        # conv channels per p1 half: q = p2*Cpr + c'
    out_dtype = x_nchw.dtype
    cdt = jnp.dtype(compute_dtype) if compute_dtype is not None else jnp.dtype(out_dtype)

    TH = _pick_h_tile(H) if h_tile is None else h_tile
    assert H % TH == 0
    TNq = _pick_q_tile(TN) if q_tile is None else q_tile
    assert TN % TNq == 0
    n_h, n_q = H // TH, TN // TNq

    Wp = _round_up(W + 2, 8)            # conv pad (1 left + 1 right) + alignment

    # ---- layout prep in XLA: transpose + pad + H-halo gather fuse into one
    #      pre-pass over the (bf16) activation bytes ----
    x_nhwc = jnp.transpose(x_nchw, (0, 2, 3, 1)).astype(cdt)
    x_pad = jnp.pad(x_nhwc, ((0, 0), (1, 2), (1, Wp - W - 1), (0, 0)))  # (B,H+3,Wp,Cin)
    row_idx = jnp.arange(n_h)[:, None] * TH + jnp.arange(TH + 3)[None, :]
    x_tiles = jnp.take(x_pad, row_idx, axis=1)        # (B, n_h, TH+3, Wp, Cin)

    # OIHW -> (p1, kh, kw, Cin, TN); conv channel co = p1*TN + q, q = p2*Cpr + c'
    w_r = jnp.transpose(weight_oihw, (2, 3, 1, 0)).reshape(3, 3, Cin, 2, TN)
    w_r = jnp.transpose(w_r, (3, 0, 1, 2, 4)).astype(cdt)
    b_r = bias.reshape(2, 1, TN).astype(jnp.float32)

    kernel = functools.partial(_conv3x3_d2s_kernel,
                               TH=TH, Wp=Wp, Cin=Cin, TNB=TNq)

    # ---- VMEM budget: double-buffered pipelined blocks + in-kernel temporaries ----
    csz = jnp.dtype(cdt).itemsize
    osz = jnp.dtype(out_dtype).itemsize
    x_blk = (TH + 3) * Wp * Cin * csz
    w_blk = 9 * Cin * TNq * csz
    b_blk = TNq * 4
    o_blk = TH * Wp * TNq * osz
    pipelined = 2 * (x_blk + w_blk + b_blk + o_blk)          # 2x: double buffering
    temps = (3 * (TH + 2) * Wp * Cin * csz                   # shifted LHS slabs
             + TH * Wp * TNq * 4                             # f32 accumulator
             + TH * Wp * TNq * osz)                          # store-cast copy
    need = pipelined + temps + (4 << 20)
    try:
        phys = pltpu.get_tpu_info().vmem_capacity_bytes      # generation-aware cap
    except Exception:
        phys = 64 << 20                                      # conservative (v7x)
    vmem_limit = int(min(max(need, 32 << 20), int(phys * 0.9)))

    out6 = pl.pallas_call(
        kernel,
        out_shape=jax.ShapeDtypeStruct((B, H, 2, Wp, TN), out_dtype),
        grid_spec=pltpu.PrefetchScalarGridSpec(
            num_scalar_prefetch=0,
            grid=(B, n_h, 2, n_q),          # (batch, H-tile, p1, Cout-tile)
            in_specs=[
                pl.BlockSpec((1, 1, TH + 3, Wp, Cin),
                             lambda b, i, j, k: (b, i, 0, 0, 0)),
                pl.BlockSpec((1, 3, 3, Cin, TNq),
                             lambda b, i, j, k: (j, 0, 0, 0, k)),
                pl.BlockSpec((1, 1, TNq),
                             lambda b, i, j, k: (j, 0, k)),
            ],
            out_specs=pl.BlockSpec((1, TH, 1, Wp, TNq),
                                   lambda b, i, j, k: (b, i, j, 0, k)),
        ),
        compiler_params=pltpu.CompilerParams(
            dimension_semantics=("parallel", "parallel", "parallel", "parallel"),
            vmem_limit_bytes=vmem_limit,
        ),
    )(x_tiles, w_r, b_r)

    # Fused depth_to_space: crop width padding, then the row-major reshape of
    # (B, H, 2, W, 2*Cpr) IS the upsampled NHWC image. Crop + reshape + NCHW
    # transpose fuse into a single XLA output pass.
    out_nhwc = out6[:, :, :, :W, :].reshape(B, 2 * H, 2 * W, Cpr)
    return jnp.transpose(out_nhwc, (0, 3, 1, 2))


def depth_to_space_nchw_ref(x, block_size):
    """DCR depth-to-space on NCHW tensors (matches the PyTorch reference)."""
    *outer, c, h, w = x.shape
    s = block_size * block_size
    assert c % s == 0
    x = x.reshape(-1, block_size, block_size, c // s, h, w)
    x = jnp.transpose(x, (0, 3, 4, 1, 5, 2))
    return x.reshape(*outer, c // s, h * block_size, w * block_size)


if __name__ == "__main__":
    key = jax.random.PRNGKey(0)
    kx, kw, kb = jax.random.split(key, 3)

    B, C, H, W = 2, 4, 16, 16
    dim, dim_out = C, C * 4                      # Upsampler: dim_out = dim * 4

    x = jax.random.normal(kx, (B, C, H, W), dtype=jnp.float32)
    weight = 0.1 * jax.random.normal(kw, (dim_out, dim, 3, 3), dtype=jnp.float32)
    bias = 0.1 * jax.random.normal(kb, (dim_out,), dtype=jnp.float32)

    # reference: XLA conv + bias + DCR depth_to_space (matches the PyTorch module)
    ref_conv = jax.lax.conv_general_dilated(
        x, weight, window_strides=(1, 1), padding="SAME",
        dimension_numbers=("NCHW", "OIHW", "NCHW"))
    ref = depth_to_space_nchw_ref(ref_conv + bias[None, :, None, None], 2)

    # exact-math path (f32 operands) -- tight check of conv + depth_to_space indexing
    out_f32 = upsampler_forward(x, weight, bias, h_tile=8,
                                compute_dtype=jnp.float32)
    out_f32 = jax.block_until_ready(out_f32)
    assert out_f32.shape == (B, C, 2 * H, 2 * W), out_f32.shape
    assert jnp.allclose(out_f32, ref, atol=1e-4, rtol=1e-4), \
        float(jnp.max(jnp.abs(out_f32 - ref)))

    # default perf path (bf16 operands, f32 accumulation, f32 output)
    out_bf16 = upsampler_forward(x, weight, bias, h_tile=8)
    out_bf16 = jax.block_until_ready(out_bf16)
    assert out_bf16.shape == (B, C, 2 * H, 2 * W), out_bf16.shape
    assert jnp.allclose(out_bf16, ref, atol=5e-2, rtol=5e-2), \
        float(jnp.max(jnp.abs(out_bf16 - ref)))

    print("KERNEL_OK")
</pallas_src>

<mosaic_0001>
module attributes {stable_mosaic.version = 11 : i64} {
  func.func @_conv3x3_d2s_kernel(%arg0: i32, %arg1: i32, %arg2: i32, %arg3: i32, %arg4: memref<1x1x11x24x4xf32, #tpu.memory_space<vmem>>, %arg5: memref<1x3x3x4x8xf32, #tpu.memory_space<vmem>>, %arg6: memref<1x1x8xf32, #tpu.memory_space<vmem>>, %arg7: memref<1x8x1x24x8xf32, #tpu.memory_space<vmem>>) attributes {dimension_semantics = [#tpu.dimension_semantics<parallel>, #tpu.dimension_semantics<parallel>, #tpu.dimension_semantics<parallel>, #tpu.dimension_semantics<parallel>], iteration_bounds = array<i64: 2, 2, 2, 1>, scalar_prefetch = 0 : i64, scratch_operands = 0 : i64, tpu.core_type = #tpu.core_type<tc>, window_params = [{transform_indices = @transform_0, window_bounds = array<i64: 1, 1, 11, 24, 4>}, {transform_indices = @transform_1, window_bounds = array<i64: 1, 3, 3, 4, 8>}, {transform_indices = @transform_2, window_bounds = array<i64: 1, 1, 8>}, {transform_indices = @transform_3, window_bounds = array<i64: 1, 8, 1, 24, 8>}]} {
    %c0 = arith.constant 0 : index
    %c0_0 = arith.constant 0 : index
    %c0_1 = arith.constant 0 : index
    %c0_2 = arith.constant 0 : index
    %c0_3 = arith.constant 0 : index
    %0 = vector.load %arg4[%c0, %c0_0, %c0_1, %c0_2, %c0_3] : memref<1x1x11x24x4xf32, #tpu.memory_space<vmem>>, vector<1x1x11x24x4xf32>
    %1 = vector.shape_cast %0 : vector<1x1x11x24x4xf32> to vector<264x4xf32>
    %2 = vector.extract_strided_slice %1 {offsets = [0, 0], sizes = [240, 4], strides = [1, 1]} : vector<264x4xf32> to vector<240x4xf32>
    %3 = vector.extract_strided_slice %1 {offsets = [1, 0], sizes = [240, 4], strides = [1, 1]} : vector<264x4xf32> to vector<240x4xf32>
    %4 = vector.extract_strided_slice %1 {offsets = [2, 0], sizes = [240, 4], strides = [1, 1]} : vector<264x4xf32> to vector<240x4xf32>
    %5 = vector.extract_strided_slice %2 {offsets = [0, 0], sizes = [192, 4], strides = [1, 1]} : vector<240x4xf32> to vector<192x4xf32>
    %c0_4 = arith.constant 0 : index
    %c0_5 = arith.constant 0 : index
    %c0_6 = arith.constant 0 : index
    %c0_7 = arith.constant 0 : index
    %c0_8 = arith.constant 0 : index
    %6 = vector.load %arg5[%c0_4, %c0_5, %c0_6, %c0_7, %c0_8] : memref<1x3x3x4x8xf32, #tpu.memory_space<vmem>>, vector<1x1x1x4x8xf32>
    %7 = vector.shape_cast %6 : vector<1x1x1x4x8xf32> to vector<4x8xf32>
    %cst = arith.constant dense<0.000000e+00> : vector<192x8xf32>
    %8 = tpu.matmul %5, %7, %cst {dimension_numbers = #tpu.dot_dimension_numbers<[1], [0], [0], [1], [0, 0, 1, 1], [], []>} : vector<192x4xf32>, vector<4x8xf32>, vector<192x8xf32> -> vector<192x8xf32>
    %9 = vector.extract_strided_slice %2 {offsets = [24, 0], sizes = [192, 4], strides = [1, 1]} : vector<240x4xf32> to vector<192x4xf32>
    %c0_9 = arith.constant 0 : index
    %c1 = arith.constant 1 : index
    %c0_10 = arith.constant 0 : index
    %c0_11 = arith.constant 0 : index
    %c0_12 = arith.constant 0 : index
    %10 = vector.load %arg5[%c0_9, %c1, %c0_10, %c0_11, %c0_12] : memref<1x3x3x4x8xf32, #tpu.memory_space<vmem>>, vector<1x1x1x4x8xf32>
    %11 = vector.shape_cast %10 : vector<1x1x1x4x8xf32> to vector<4x8xf32>
    %cst_13 = arith.constant dense<0.000000e+00> : vector<192x8xf32>
    %12 = tpu.matmul %9, %11, %cst_13 {dimension_numbers = #tpu.dot_dimension_numbers<[1], [0], [0], [1], [0, 0, 1, 1], [], []>} : vector<192x4xf32>, vector<4x8xf32>, vector<192x8xf32> -> vector<192x8xf32>
    %13 = arith.addf %8, %12 : vector<192x8xf32>
    %14 = vector.extract_strided_slice %2 {offsets = [48, 0], sizes = [192, 4], strides = [1, 1]} : vector<240x4xf32> to vector<192x4xf32>
    %c0_14 = arith.constant 0 : index
    %c2 = arith.constant 2 : index
    %c0_15 = arith.constant 0 : index
    %c0_16 = arith.constant 0 : index
    %c0_17 = arith.constant 0 : index
    %15 = vector.load %arg5[%c0_14, %c2, %c0_15, %c0_16, %c0_17] : memref<1x3x3x4x8xf32, #tpu.memory_space<vmem>>, vector<1x1x1x4x8xf32>
    %16 = vector.shape_cast %15 : vector<1x1x1x4x8xf32> to vector<4x8xf32>
    %cst_18 = arith.constant dense<0.000000e+00> : vector<192x8xf32>
    %17 = tpu.matmul %14, %16, %cst_18 {dimension_numbers = #tpu.dot_dimension_numbers<[1], [0], [0], [1], [0, 0, 1, 1], [], []>} : vector<192x4xf32>, vector<4x8xf32>, vector<192x8xf32> -> vector<192x8xf32>
    %18 = arith.addf %13, %17 : vector<192x8xf32>
    %19 = vector.extract_strided_slice %3 {offsets = [0, 0], sizes = [192, 4], strides = [1, 1]} : vector<240x4xf32> to vector<192x4xf32>
    %c0_19 = arith.constant 0 : index
    %c0_20 = arith.constant 0 : index
    %c1_21 = arith.constant 1 : index
    %c0_22 = arith.constant 0 : index
    %c0_23 = arith.constant 0 : index
    %20 = vector.load %arg5[%c0_19, %c0_20, %c1_21, %c0_22, %c0_23] : memref<1x3x3x4x8xf32, #tpu.memory_space<vmem>>, vector<1x1x1x4x8xf32>
    %21 = vector.shape_cast %20 : vector<1x1x1x4x8xf32> to vector<4x8xf32>
    %cst_24 = arith.constant dense<0.000000e+00> : vector<192x8xf32>
    %22 = tpu.matmul %19, %21, %cst_24 {dimension_numbers = #tpu.dot_dimension_numbers<[1], [0], [0], [1], [0, 0, 1, 1], [], []>} : vector<192x4xf32>, vector<4x8xf32>, vector<192x8xf32> -> vector<192x8xf32>
    %23 = arith.addf %18, %22 : vector<192x8xf32>
    %24 = vector.extract_strided_slice %3 {offsets = [24, 0], sizes = [192, 4], strides = [1, 1]} : vector<240x4xf32> to vector<192x4xf32>
    %c0_25 = arith.constant 0 : index
    %c1_26 = arith.constant 1 : index
    %c1_27 = arith.constant 1 : index
    %c0_28 = arith.constant 0 : index
    %c0_29 = arith.constant 0 : index
    %25 = vector.load %arg5[%c0_25, %c1_26, %c1_27, %c0_28, %c0_29] : memref<1x3x3x4x8xf32, #tpu.memory_space<vmem>>, vector<1x1x1x4x8xf32>
    %26 = vector.shape_cast %25 : vector<1x1x1x4x8xf32> to vector<4x8xf32>
    %cst_30 = arith.constant dense<0.000000e+00> : vector<192x8xf32>
    %27 = tpu.matmul %24, %26, %cst_30 {dimension_numbers = #tpu.dot_dimension_numbers<[1], [0], [0], [1], [0, 0, 1, 1], [], []>} : vector<192x4xf32>, vector<4x8xf32>, vector<192x8xf32> -> vector<192x8xf32>
    %28 = arith.addf %23, %27 : vector<192x8xf32>
    %29 = vector.extract_strided_slice %3 {offsets = [48, 0], sizes = [192, 4], strides = [1, 1]} : vector<240x4xf32> to vector<192x4xf32>
    %c0_31 = arith.constant 0 : index
    %c2_32 = arith.constant 2 : index
    %c1_33 = arith.constant 1 : index
    %c0_34 = arith.constant 0 : index
    %c0_35 = arith.constant 0 : index
    %30 = vector.load %arg5[%c0_31, %c2_32, %c1_33, %c0_34, %c0_35] : memref<1x3x3x4x8xf32, #tpu.memory_space<vmem>>, vector<1x1x1x4x8xf32>
    %31 = vector.shape_cast %30 : vector<1x1x1x4x8xf32> to vector<4x8xf32>
    %cst_36 = arith.constant dense<0.000000e+00> : vector<192x8xf32>
    %32 = tpu.matmul %29, %31, %cst_36 {dimension_numbers = #tpu.dot_dimension_numbers<[1], [0], [0], [1], [0, 0, 1, 1], [], []>} : vector<192x4xf32>, vector<4x8xf32>, vector<192x8xf32> -> vector<192x8xf32>
    %33 = arith.addf %28, %32 : vector<192x8xf32>
    %34 = vector.extract_strided_slice %4 {offsets = [0, 0], sizes = [192, 4], strides = [1, 1]} : vector<240x4xf32> to vector<192x4xf32>
    %c0_37 = arith.constant 0 : index
    %c0_38 = arith.constant 0 : index
    %c2_39 = arith.constant 2 : index
    %c0_40 = arith.constant 0 : index
    %c0_41 = arith.constant 0 : index
    %35 = vector.load %arg5[%c0_37, %c0_38, %c2_39, %c0_40, %c0_41] : memref<1x3x3x4x8xf32, #tpu.memory_space<vmem>>, vector<1x1x1x4x8xf32>
    %36 = vector.shape_cast %35 : vector<1x1x1x4x8xf32> to vector<4x8xf32>
    %cst_42 = arith.constant dense<0.000000e+00> : vector<192x8xf32>
    %37 = tpu.matmul %34, %36, %cst_42 {dimension_numbers = #tpu.dot_dimension_numbers<[1], [0], [0], [1], [0, 0, 1, 1], [], []>} : vector<192x4xf32>, vector<4x8xf32>, vector<192x8xf32> -> vector<192x8xf32>
    %38 = arith.addf %33, %37 : vector<192x8xf32>
    %39 = vector.extract_strided_slice %4 {offsets = [24, 0], sizes = [192, 4], strides = [1, 1]} : vector<240x4xf32> to vector<192x4xf32>
    %c0_43 = arith.constant 0 : index
    %c1_44 = arith.constant 1 : index
    %c2_45 = arith.constant 2 : index
    %c0_46 = arith.constant 0 : index
    %c0_47 = arith.constant 0 : index
    %40 = vector.load %arg5[%c0_43, %c1_44, %c2_45, %c0_46, %c0_47] : memref<1x3x3x4x8xf32, #tpu.memory_space<vmem>>, vector<1x1x1x4x8xf32>
    %41 = vector.shape_cast %40 : vector<1x1x1x4x8xf32> to vector<4x8xf32>
    %cst_48 = arith.constant dense<0.000000e+00> : vector<192x8xf32>
    %42 = tpu.matmul %39, %41, %cst_48 {dimension_numbers = #tpu.dot_dimension_numbers<[1], [0], [0], [1], [0, 0, 1, 1], [], []>} : vector<192x4xf32>, vector<4x8xf32>, vector<192x8xf32> -> vector<192x8xf32>
    %43 = arith.addf %38, %42 : vector<192x8xf32>
    %44 = vector.extract_strided_slice %4 {offsets = [48, 0], sizes = [192, 4], strides = [1, 1]} : vector<240x4xf32> to vector<192x4xf32>
    %c0_49 = arith.constant 0 : index
    %c2_50 = arith.constant 2 : index
    %c2_51 = arith.constant 2 : index
    %c0_52 = arith.constant 0 : index
    %c0_53 = arith.constant 0 : index
    %45 = vector.load %arg5[%c0_49, %c2_50, %c2_51, %c0_52, %c0_53] : memref<1x3x3x4x8xf32, #tpu.memory_space<vmem>>, vector<1x1x1x4x8xf32>
    %46 = vector.shape_cast %45 : vector<1x1x1x4x8xf32> to vector<4x8xf32>
    %cst_54 = arith.constant dense<0.000000e+00> : vector<192x8xf32>
    %47 = tpu.matmul %44, %46, %cst_54 {dimension_numbers = #tpu.dot_dimension_numbers<[1], [0], [0], [1], [0, 0, 1, 1], [], []>} : vector<192x4xf32>, vector<4x8xf32>, vector<192x8xf32> -> vector<192x8xf32>
    %48 = arith.addf %43, %47 : vector<192x8xf32>
    %c0_55 = arith.constant 0 : index
    %c0_56 = arith.constant 0 : index
    %c0_57 = arith.constant 0 : index
    %49 = vector.load %arg6[%c0_55, %c0_56, %c0_57] : memref<1x1x8xf32, #tpu.memory_space<vmem>>, vector<1x1x8xf32>
    %50 = vector.shape_cast %49 : vector<1x1x8xf32> to vector<1x8xf32>
    %51 = vector.broadcast %50 : vector<1x8xf32> to vector<192x8xf32>
    %52 = arith.addf %48, %51 : vector<192x8xf32>
    %53 = vector.shape_cast %52 : vector<192x8xf32> to vector<1x8x1x24x8xf32>
    %c0_58 = arith.constant 0 : index
    %c0_59 = arith.constant 0 : index
    %c0_60 = arith.constant 0 : index
    %c0_61 = arith.constant 0 : index
    %c0_62 = arith.constant 0 : index
    %54 = vector.load %arg7[%c0_58, %c0_59, %c0_60, %c0_61, %c0_62] : memref<1x8x1x24x8xf32, #tpu.memory_space<vmem>>, vector<1x8x1x24x8xf32>
    tpu.vector_store %arg7[%c0_58, %c0_59, %c0_60, %c0_61, %c0_62], %53 {strides = array<i32>} : memref<1x8x1x24x8xf32, #tpu.memory_space<vmem>>, vector<1x8x1x24x8xf32>,
    return
  }
  func.func @transform_0(%arg0: i32, %arg1: i32, %arg2: i32, %arg3: i32) -> (i32, i32, i32, i32, i32) {
    %c0_i32 = arith.constant 0 : i32
    %c0_i32_0 = arith.constant 0 : i32
    %c0_i32_1 = arith.constant 0 : i32
    %c0_i32_2 = arith.constant 0 : i32
    return %arg0, %arg1, %c0_i32, %c0_i32_0, %c0_i32_1 : i32, i32, i32, i32, i32
  }
  func.func @transform_1(%arg0: i32, %arg1: i32, %arg2: i32, %arg3: i32) -> (i32, i32, i32, i32, i32) {
    %c0_i32 = arith.constant 0 : i32
    %c0_i32_0 = arith.constant 0 : i32
    %c0_i32_1 = arith.constant 0 : i32
    %c0_i32_2 = arith.constant 0 : i32
    return %arg2, %c0_i32, %c0_i32_0, %c0_i32_1, %arg3 : i32, i32, i32, i32, i32
  }
  func.func @transform_2(%arg0: i32, %arg1: i32, %arg2: i32, %arg3: i32) -> (i32, i32, i32) {
    %c0_i32 = arith.constant 0 : i32
    %c0_i32_0 = arith.constant 0 : i32
    return %arg2, %c0_i32, %arg3 : i32, i32, i32
  }
  func.func @transform_3(%arg0: i32, %arg1: i32, %arg2: i32, %arg3: i32) -> (i32, i32, i32, i32, i32) {
    %c0_i32 = arith.constant 0 : i32
    %c0_i32_0 = arith.constant 0 : i32
    return %arg0, %arg1, %arg2, %c0_i32, %arg3 : i32, i32, i32, i32, i32
  }
}

</mosaic_0001>

<bundles_post_ra>
// kernel: tpu_custom_call.1
= control target key start
LH: loop header
LB: loop body
LE: loop exit
PB: predicated region body
PF: predicated region fallthrough
CT: control target
= control target key end

     0   :  { %s2383_s12 = smov 0   ;;  %s2385_s13 = smov 0   ;;  %s3526_s0 = inlined_call_operand.vmem [shape: f32[2,2,11,24,4], index: 0, kind: input, shape index: {}]   ;;  %s3527_s1 = inlined_call_operand.vmem [shape: f32[2,3,3,4,8], index: 1, kind: input, shape index: {}]   ;;  %s3528_s2 = inlined_call_operand.vmem [shape: f32[2,1,8], index: 2, kind: input, shape index: {}]   ;;  %s3529_s3 = inlined_call_operand.vmem [shape: f32[2,16,2,24,8], index: 3, kind: output, shape index: {}]  }
   0x1   :  { %s2387_s14 = smov 0   ;;  %s2389_s15 = smov 0  }
   0x2   :  { %s2391_s16 = smov 0   ;;  %s2393_s17 = smov 0  }
   0x3   :  { %s2395_s18 = smov 0   ;;  %s2397_s19 = smov 0  }
   0x4   :  { %s2399_s20 = smov 0  }
   0x5 LB: > { %s31_s21 = sadd.s32 1, %s2349_s17  ;;  %s35_s22 = sadd.s32 1, %s2353_s18  ;;  %s2361_s20 = sphi %s2399_s20, %s13_s20   ;;  %s2357_s19 = sphi %s2397_s19, %s3593_s19   ;;  %s2353_s18 = sphi %s2395_s18, %s3592_s18   ;;  %s2349_s17 = sphi %s2393_s17, %s3591_s17   ;;  %s2345_s16 = sphi %s2391_s16, %s3590_s16   ;;  %s2341_s15 = sphi %s2389_s15, %s3589_s15   ;;  %s2337_s14 = sphi %s2387_s14, %s3588_s14   ;;  %s2333_s13 = sphi %s2385_s13, %s3587_s13   ;;  %s2329_s12 = sphi %s2383_s12, %s3586_s12  }
   0x6   : > { %p33_p0 = scmp.ge.s32.totalorder %s31_s21, 2  ;;  %s1959_s23 = sadd.s32 4294967295, %s2361_s20  }
   0x7   : > { %s39_s24 = sadd.s32 1, %s2357_s19  ;;  %p146_p1 = scmp.ne.s32.totalorder %s2333_s13, %s2329_s12 }
   0x8   : > { %s3595_s21 = smov (%p33_p0, %s31_s21), 0  ;;  %s3597_s22 = smov (!%p33_p0, %s35_s22), %s2353_s18 }
   0x9   : > { %p37_p2 = scmp.ge.s32.totalorder %s3597_s22, 2  ;;  %p147_p3 = scmp.eq.s32.totalorder %s1959_s23, 7 }
   0xa   : > { %p1963_p4 = scmp.ge.s32.totalorder %s2361_s20, 1  ;;  %p203_p5 = scmp.lt.s32.totalorder %s2361_s20, 9 }
   0xb   : > { %s3599_s22 = smov (%p37_p2, %s3597_s22), 0  ;;  %s3601_s24 = smov (!%p37_p2, %s39_s24), %s2357_s19 }
   0xc   : > { %p2442_p6 = por %p147_p3, %p146_p1  ;;  %p41_p7 = scmp.ge.s32.totalorder %s3601_s24, 2 }
   0xd   : > { %p204_p8 = pnand %p1963_p4, %p203_p5  ;;  %s128_s26 = ssub.s32 %s2353_s18, %s3599_s22 }
   0xe   : > { %s3603_s24 = smov (%p41_p7, %s3601_s24), 0  ;;  %s130_s27 = ssub.s32 %s2349_s17, %s3595_s21 }
   0xf   : > { %s127_s28 = ssub.s32 %s2357_s19, %s3603_s24  ;;  %s136_s4 = sadd.s32 1, %s2333_s13 }
  0x10   : > { %s129_s29 = sor.u32 %s128_s26, %s127_s28  ;;  %207 = sbr.rel (%p204_p8) target bundleno = 607 (0x25f), region = 32 }
  0x11   : > { %s131_s30 = sor.u32 %s130_s27, %s129_s29 }
  0x12   : > { %p134_p9 = scmp.eq.s32.totalorder %s131_s30, 0 }
  0x14   : > { %s2456_s5 = scalar_select %p134_p9, %s2333_s13, %s136_s4  }
  0x15   : > { %p253_p10 = scmp.lt.s32.totalorder %s2337_s14, 1  ;;  %p244_p11 = scmp.lt.s32.totalorder %s2345_s16, 1  ;;  %vm375_vm0 = vcmask 1043456   ;;  %vm302_vm1 = vcmask 31744   ;;  %vm698_vm2 = vcmask 1046528   ;;  %vm1175_vm3 = vcmask 1045504  }
  0x16   : > { %p246_p12 = scmp.lt.s32.totalorder %s2341_s15, 1  ;;  %vm1677_vm4 = vcmask 64512  }
  0x17   : > { %s2462_s6 = scalar_select %p253_p10, %s2337_s14, 1 }
  0x18   : > { %s245_s7 = scalar_select %p244_p11, %s2345_s16, 1 }
  0x19   : > { %s2210_s8 = smul.u32 36, %s2462_s6  ;;  %s266_s11 = scalar_lea.vmem %s3528_s2, %s2462_s6 }
  0x1a   : > { %s247_s23 = scalar_select %p246_p12, %s2341_s15, 1 }
  0x1b   : > { %s2474_s28 = scalar_lea.vmem %s3527_s1, %s2210_s8  ;;  %s2209_s29 = smul.u32 66, %s245_s7 }
  0x1c   : > { %v1966_v0 = vld [vmem:[%s2474_s28 + $0xc] sm:$0xf]  ;;  %s2208_s30 = smul.u32 33, %s247_s23  ;;  %v2017_v1 = vld [vmem:[%s2474_s28 + $0x18] sm:$0xf]  ;;  %s241_s23 = sand.u32 1, %s2329_s12  }
  0x1d   : > { %2204 = vmatpush.msk.msra.mxu1 %vm375_vm0, %v1966_v0  ;;  %2205 = vmatpush.msk.msra.mxu2 %vm375_vm0, %v1966_v0  ;;  %v2043_v2 = vld [vmem:[%s2474_s28 + $0x4] sm:$0xf]  ;;  %v299_v3 = vld [vmem:[%s2474_s28] sm:$0xf]  ;;  %v2069_v4 = vld [vmem:[%s2474_s28 + $0x10] sm:$0xf] }
  0x1e   : > { %s250_s4 = sadd.s32 %s2209_s29, %s2208_s30  ;;  %2206 = vmatpush.msk.msra.mxu3 %vm375_vm0, %v1966_v0  ;;  %1967 = vmatpush.msk.msra.mxu0 %vm375_vm0, %v1966_v0  ;;  %v2121_v17 = vld [vmem:[%s2474_s28 + $0x8] sm:$0xf]  ;;  %v2147_v18 = vld [vmem:[%s2474_s28 + $0x14] sm:$0xf]  ;;  %v2095_v19 = vld [vmem:[%s2474_s28 + $0x1c] sm:$0xf] }
  0x1f   : > { %2018 = vmatpush.msk.msrb.mxu2 %vm375_vm0, %v2017_v1  ;;  %s1964_s8 = sshll.u32 %s250_s4, 3  ;;  %1992 = vmatpush.msk.msrb.mxu1 %vm375_vm0, %v299_v3  ;;  %v2173_v24 = vld [vmem:[%s2474_s28 + $0x20] sm:$0xf]  ;;  %s2207_s26 = smul.u32 192, %s241_s23 }
  0x20   : > { %2044 = vmatpush.msk.msrb.mxu3 %vm375_vm0, %v2043_v2  ;;  %s2490_s10 = scalar_lea.vmem %s3526_s0, %s1964_s8  ;;  %2070 = vmatpush.msk.msrb.mxu0 %vm375_vm0, %v2069_v4  ;;  %s2211_s6 = smul.u32 (%p2442_p6), 3, %s2337_s14 }
  0x21   : > { %v2494_v5 = vld [vmem:[%s2490_s10 + $0x48] sm:$0xff]  ;;  %v2497_v6 = vld [vmem:[%s2490_s10 + $0x78] sm:$0xff]  ;;  %v2515_v9 = vld [vmem:[%s2490_s10 + $0x50] sm:$0xff]  ;;  %s3282_s12 = scalar_lea.vmem [#allocation2], %s2207_s26  ;;  %s2213_s29 = smul.u32 (%p2442_p6), 96, %s2345_s16 }
  0x22   : > { %3540 = vst [vmem:[#allocation3_spill] sm:$0xff] %v2497_v6  ;;  %v2500_v7 = vld [vmem:[%s2490_s10 + $0xa8] sm:$0xff]  ;;  %1974 = vmatmul.msk.f32.vlgmr.msra.gmra.mxu1 %vm302_vm1, %v2494_v5  ;;  %1980 = vmatmul.msk.f32.vlgmr.msra.gmra.mxu2 %vm302_vm1, %v2497_v6  ;;  %v2508_v8 = vld [vmem:[%s2490_s10 + $0x18] sm:$0xff]  ;;  %v2518_v10 = vld [vmem:[%s2490_s10 + $0x80] sm:$0xff]  ;;  %v716_v53 = vrot.slane %v2494_v5, 1  ;;  %v718_v55 = vrot.slane %v2515_v9, 1 }
  0x23   : > { %1986 = vmatmul.msk.f32.vlgmr.msra.gmra.mxu3 %vm302_vm1, %v2500_v7  ;;  %1968 = vmatmul.msk.f32.vlgmr.msra.gmra.mxu0 %vm302_vm1, %v2508_v8  ;;  %3541 = vst [vmem:[#allocation4_spill] sm:$0xff] %v2518_v10  ;;  %v2521_v11 = vld [vmem:[%s2490_s10 + $0xb0] sm:$0xff]  ;;  %v2524_v12 = vld [vmem:[%s2490_s10 + $0x20] sm:$0xff]  ;;  %v2535_v13 = vld [vmem:[%s2490_s10 + $0x58] sm:$0xff]  ;;  %v704_v35 = vrot.slane %v2508_v8, 1  ;;  %v728_v3 = vrot.slane %v2497_v6, 1 }
  0x24   : > { %v2538_v14 = vld [vmem:[%s2490_s10 + $0x88] sm:$0xff]  ;;  %v2541_v15 = vld [vmem:[%s2490_s10 + $0xb8] sm:$0xff]  ;;  %2122 = vmatpush.msk.msra.mxu2 %vm375_vm0, %v2121_v17  ;;  %2148 = vmatpush.msk.msra.mxu3 %vm375_vm0, %v2147_v18  ;;  %v2561_v20 = vld [vmem:[%s2490_s10 + $0x60] sm:$0xff]  ;;  %v706_v36 = vrot.slane %v2524_v12, 1  ;;  %v2697_v56 = vsel %vm698_vm2, %v716_v53, %v718_v55  ;;  %v720_v57 = vrot.slane %v2535_v13, 1 }
  0x25   : > { %v2544_v16 = vld [vmem:[%s2490_s10 + $0x28] sm:$0xff]  ;;  %2096 = vmatpush.msk.msra.mxu1 %vm375_vm0, %v2095_v19  ;;  %v2564_v21 = vld [vmem:[%s2490_s10 + $0x90] sm:$0xff]  ;;  %v2567_v22 = vld [vmem:[%s2490_s10 + $0xc0] sm:$0xff]  ;;  %2174 = vmatpush.msk.msra.mxu0 %vm375_vm0, %v2173_v24  ;;  %v722_v59 = vrot.slane %v2561_v20, 1 }
  0x26   : > { %v2570_v23 = vld [vmem:[%s2490_s10 + $0x30] sm:$0xff]  ;;  %v2583_v25 = vld [vmem:[%s2490_s10 + $0x68] sm:$0xff]  ;;  %v2586_v26 = vld [vmem:[%s2490_s10 + $0x98] sm:$0xff]  ;;  %v707_v40 = vsel %vm698_vm2, %v704_v35, %v706_v36  ;;  %v708_v43 = vrot.slane %v2544_v16, 1  ;;  %v2709_v58 = vsel %vm698_vm2, %v718_v55, %v720_v57 }
  0x27   : > { %v2589_v27 = vld [vmem:[%s2490_s10 + $0xc8] sm:$0xff]  ;;  %v2592_v28 = vld [vmem:[%s2490_s10 + $0x38] sm:$0xff]  ;;  %v2603_v29 = vld [vmem:[%s2490_s10 + $0x70] sm:$0xff]  ;;  %v710_v46 = vrot.slane %v2570_v23, 1  ;;  %v2721_v60 = vsel %vm698_vm2, %v720_v57, %v722_v59  ;;  %v724_v61 = vrot.slane %v2583_v25, 1 }
  0x28   : > { %v2606_v30 = vld [vmem:[%s2490_s10 + $0xa0] sm:$0xff]  ;;  %v2609_v31 = vld [vmem:[%s2490_s10 + $0xd0] sm:$0xff]  ;;  %v2618_v34 = vld [vmem:[%s2490_s10 + $0x8] sm:$0xff]  ;;  %v709_v45 = vsel %vm698_vm2, %v706_v36, %v708_v43  ;;  %v712_v49 = vrot.slane %v2592_v28, 1  ;;  %v726_v63 = vrot.slane %v2603_v29, 1 }
  0x29   : > { %v2612_v32 = vld [vmem:[%s2490_s10 + $0x40] sm:$0xff]  ;;  %v700_v38 = vrot.slane %v2618_v34, 1  ;;  %v2635_v41 = vld [vmem:[%s2490_s10 + $0x10] sm:$0xff]  ;;  %v711_v48 = vsel %vm698_vm2, %v708_v43, %v710_v46  ;;  %v2733_v62 = vsel %vm698_vm2, %v722_v59, %v724_v61  ;;  %v736_v59 = vrot.slane %v2586_v26, 1 }
  0x2a   : > { %1975 = vmatmul.msk.f32.gmra.mxu1 %vm302_vm1, %v2515_v9  ;;  %1981 = vmatmul.msk.f32.gmra.mxu2 %vm302_vm1, %v2518_v10  ;;  %v2615_v33 = vld [vmem:[%s2490_s10] sm:$0xff]  ;;  %v702_v42 = vrot.slane %v2635_v41, 1  ;;  %v2664_v50 = vsel %vm698_vm2, %v710_v46, %v712_v49  ;;  %v714_v51 = vrot.slane %v2612_v32, 1  ;;  %v2749_v2 = vsel %vm698_vm2, %v724_v61, %v726_v63 }
  0x2b   : > { %1987 = vmatmul.msk.f32.gmra.mxu3 %vm302_vm1, %v2521_v11  ;;  %1969 = vmatmul.msk.f32.gmra.mxu0 %vm302_vm1, %v2524_v12  ;;  %v699_v37 = vrot.slane %v2615_v33, 1  ;;  %3542 = vst [vmem:[#allocation5_spill] sm:$0xff] %v2749_v2  ;;  %v2769_v24 = vsel %vm698_vm2, %v726_v63, %v728_v3 }
  0x2c   : > { %v703_v44 = vsel %vm698_vm2, %v700_v38, %v702_v42  ;;  %v705_v47 = vsel %vm698_vm2, %v702_v42, %v704_v35  ;;  %v2675_v52 = vsel %vm698_vm2, %v712_v49, %v714_v51  ;;  %v2686_v54 = vsel %vm698_vm2, %v714_v51, %v716_v53  ;;  %3544 = vst [vmem:[#allocation7_spill] sm:$0xff] %v2769_v24 }
  0x2d   : > { %v701_v39 = vsel %vm698_vm2, %v699_v37, %v700_v38  ;;  %v730_v35 = vrot.slane %v2518_v10, 1  ;;  %v732_v42 = vrot.slane %v2538_v14, 1 }
  0x32   : > { %1976 = vmatmul.msk.f32.gmra.mxu1 %vm302_vm1, %v2535_v13  ;;  %1982 = vmatmul.msk.f32.gmra.mxu2 %vm302_vm1, %v2538_v14 }
  0x33   : > { %1988 = vmatmul.msk.f32.gmra.mxu3 %vm302_vm1, %v2541_v15  ;;  %1970 = vmatmul.msk.f32.gmra.mxu0 %vm302_vm1, %v2544_v16 }
  0x3a   : > { %1977 = vmatmul.msk.f32.gmra.mxu1 %vm302_vm1, %v2561_v20  ;;  %1983 = vmatmul.msk.f32.gmra.mxu2 %vm302_vm1, %v2564_v21 }
  0x3b   : > { %1989 = vmatmul.msk.f32.gmra.mxu3 %vm302_vm1, %v2567_v22  ;;  %1971 = vmatmul.msk.f32.gmra.mxu0 %vm302_vm1, %v2570_v23 }
  0x42   : > { %1978 = vmatmul.msk.f32.gmra.mxu1 %vm302_vm1, %v2583_v25  ;;  %1984 = vmatmul.msk.f32.gmra.mxu2 %vm302_vm1, %v2586_v26 }
  0x43   : > { %1990 = vmatmul.msk.f32.gmra.mxu3 %vm302_vm1, %v2589_v27  ;;  %1972 = vmatmul.msk.f32.gmra.mxu0 %vm302_vm1, %v2592_v28 }
  0x4a   : > { %1979 = vmatmul.msk.f32.gmra.mxu1 %vm302_vm1, %v2603_v29  ;;  %1985 = vmatmul.msk.f32.gmra.mxu2 %vm302_vm1, %v2606_v30 }
  0x4b   : > { %1991 = vmatmul.msk.f32.gmra.mxu3 %vm302_vm1, %v2609_v31  ;;  %1973 = vmatmul.msk.f32.gmra.mxu0 %vm302_vm1, %v2612_v32 }
  0x52   : > { %1993 = vmatmul.msk.f32.vlgmr.msrb.gmra.mxu1 %vm302_vm1, %v2615_v33  ;;  %2019 = vmatmul.msk.f32.vlgmr.msrb.gmra.mxu2 %vm302_vm1, %v2570_v23 }
  0x53   : > { %2045 = vmatmul.msk.f32.vlgmr.msrb.gmra.mxu3 %vm302_vm1, %v701_v39  ;;  %2071 = vmatmul.msk.f32.vlgmr.msrb.gmra.mxu0 %vm302_vm1, %v707_v40 }
  0x5a   : > { %1994 = vmatmul.msk.f32.gmra.mxu1 %vm302_vm1, %v2618_v34  ;;  %2020 = vmatmul.msk.f32.gmra.mxu2 %vm302_vm1, %v2592_v28 }
  0x5b   : > { %2046 = vmatmul.msk.f32.gmra.mxu3 %vm302_vm1, %v703_v44  ;;  %2072 = vmatmul.msk.f32.gmra.mxu0 %vm302_vm1, %v709_v45 }
  0x62   : > { %1995 = vmatmul.msk.f32.gmra.mxu1 %vm302_vm1, %v2635_v41  ;;  %2021 = vmatmul.msk.f32.gmra.mxu2 %vm302_vm1, %v2612_v32 }
  0x63   : > { %2047 = vmatmul.msk.f32.gmra.mxu3 %vm302_vm1, %v705_v47  ;;  %2073 = vmatmul.msk.f32.gmra.mxu0 %vm302_vm1, %v711_v48  ;;  %v2809_v47 = vsel %vm698_vm2, %v730_v35, %v732_v42 }
  0x6a   : > { %1996 = vmatmul.msk.f32.gmra.mxu1 %vm302_vm1, %v2508_v8  ;;  %2022 = vmatmul.msk.f32.gmra.mxu2 %vm302_vm1, %v2494_v5 }
  0x6b   : > { %2048 = vmatmul.msk.f32.gmra.mxu3 %vm302_vm1, %v707_v40  ;;  %2074 = vmatmul.msk.f32.gmra.mxu0 %vm302_vm1, %v2664_v50  ;;  %v2789_v40 = vsel %vm698_vm2, %v728_v3, %v730_v35 }
  0x6c   : > { %3546 = vst [vmem:[#allocation9_spill] sm:$0xff] %v2789_v40 }
  0x72   : > { %1997 = vmatmul.msk.f32.gmra.mxu1 %vm302_vm1, %v2524_v12  ;;  %2023 = vmatmul.msk.f32.gmra.mxu2 %vm302_vm1, %v2515_v9 }
  0x73   : > { %2049 = vmatmul.msk.f32.gmra.mxu3 %vm302_vm1, %v709_v45  ;;  %2075 = vmatmul.msk.f32.gmra.mxu0 %vm302_vm1, %v2675_v52 }
  0x7a   : > { %1998 = vmatmul.msk.f32.gmra.mxu1 %vm302_vm1, %v2544_v16  ;;  %2024 = vmatmul.msk.f32.gmra.mxu2 %vm302_vm1, %v2535_v13 }
  0x7b   : > { %2050 = vmatmul.msk.f32.gmra.mxu3 %vm302_vm1, %v711_v48  ;;  %2076 = vmatmul.msk.f32.gmra.mxu0 %vm302_vm1, %v2686_v54  ;;  %v734_v48 = vrot.slane %v2564_v21, 1 }
  0x7d   : > { %v2829_v57 = vsel %vm698_vm2, %v732_v42, %v734_v48  ;;  %v2849_v42 = vsel %vm698_vm2, %v734_v48, %v736_v59 }
  0x82   : > { %1999 = vmatmul.msk.f32.gmra.mxu1 %vm302_vm1, %v2570_v23  ;;  %2025 = vmatmul.msk.f32.gmra.mxu2 %vm302_vm1, %v2561_v20 }
  0x83   : > { %2051 = vmatmul.msk.f32.gmra.mxu3 %vm302_vm1, %v2664_v50  ;;  %2077 = vmatmul.msk.f32.gmra.mxu0 %vm302_vm1, %v2697_v56 }
  0x8a   : > { %2000 = vmatmul.msk.f32.gmra.mxu1 %vm302_vm1, %v2592_v28  ;;  %2026 = vmatmul.msk.f32.gmra.mxu2 %vm302_vm1, %v2583_v25 }
  0x8b   : > { %2052 = vmatmul.msk.f32.gmra.mxu3 %vm302_vm1, %v2675_v52  ;;  %2078 = vmatmul.msk.f32.gmra.mxu0 %vm302_vm1, %v2709_v58 }
  0x92   : > { %2001 = vmatmul.msk.f32.gmra.mxu1 %vm302_vm1, %v2612_v32  ;;  %2027 = vmatmul.msk.f32.gmra.mxu2 %vm302_vm1, %v2603_v29 }
  0x93   : > { %2053 = vmatmul.msk.f32.gmra.mxu3 %vm302_vm1, %v2686_v54  ;;  %2079 = vmatmul.msk.f32.gmra.mxu0 %vm302_vm1, %v2721_v60 }
  0x9a   : > { %2002 = vmatmul.msk.f32.gmra.mxu1 %vm302_vm1, %v2494_v5  ;;  %2028 = vmatmul.msk.f32.gmra.mxu2 %vm302_vm1, %v2497_v6 }
  0x9b   : > { %2054 = vmatmul.msk.f32.gmra.mxu3 %vm302_vm1, %v2697_v56  ;;  %2080 = vmatmul.msk.f32.gmra.mxu0 %vm302_vm1, %v2733_v62 }
  0x9f   : > { %v2744_v0 = vpop.f32.mrf.mxu1 }
  0xa0   : > { %v2746_v1 = vpop.f32.mrf.mxu0 }
  0xa2   : > { %2003 = vmatmul.msk.f32.gmra.mxu1 %vm302_vm1, %v2515_v9  ;;  %2029 = vmatmul.msk.f32.gmra.mxu2 %vm302_vm1, %v2518_v10 }
  0xa3   : > { %2055 = vmatmul.msk.f32.gmra.mxu3 %vm302_vm1, %v2709_v58  ;;  %2081 = vmatmul.msk.f32.gmra.mxu0 %vm302_vm1, %v2749_v2 }
  0xa5   : > { %v2760_v4 = vpop.f32.mrf.mxu2 }
  0xa6   : > { %v2762_v17 = vpop.f32.mrf.mxu3 }
  0xa7   : > { %3543 = vst [vmem:[#allocation6_spill] sm:$0xff] %v2762_v17  ;;  %v2764_v18 = vpop.f32.mrf.mxu1 }
  0xa8   : > { %v2766_v19 = vpop.f32.mrf.mxu0 }
  0xaa   : > { %2004 = vmatmul.msk.f32.gmra.mxu1 %vm302_vm1, %v2535_v13  ;;  %2030 = vmatmul.msk.f32.gmra.mxu2 %vm302_vm1, %v2538_v14 }
  0xab   : > { %2056 = vmatmul.msk.f32.gmra.mxu3 %vm302_vm1, %v2721_v60  ;;  %2082 = vmatmul.msk.f32.gmra.mxu0 %vm302_vm1, %v2769_v24 }
  0xad   : > { %v2780_v36 = vpop.f32.mrf.mxu2 }
  0xae   : > { %v2782_v37 = vpop.f32.mrf.mxu3 }
  0xaf   : > { %3545 = vst [vmem:[#allocation8_spill] sm:$0xff] %v2782_v37  ;;  %v2784_v38 = vpop.f32.mrf.mxu1 }
  0xb0   : > { %v2786_v39 = vpop.f32.mrf.mxu0 }
  0xb2   : > { %2005 = vmatmul.msk.f32.gmra.mxu1 %vm302_vm1, %v2561_v20  ;;  %2031 = vmatmul.msk.f32.gmra.mxu2 %vm302_vm1, %v2564_v21 }
  0xb3   : > { %2057 = vmatmul.msk.f32.gmra.mxu3 %vm302_vm1, %v2733_v62  ;;  %2083 = vmatmul.msk.f32.gmra.mxu0 %vm302_vm1, %v2789_v40 }
  0xb5   : > { %v2800_v43 = vpop.f32.mrf.mxu2 }
  0xb6   : > { %v2802_v44 = vpop.f32.mrf.mxu3 }
  0xb7   : > { %3547 = vst [vmem:[#allocation10_spill] sm:$0xff] %v2802_v44  ;;  %v2804_v45 = vpop.f32.mrf.mxu1 }
  0xb8   : > { %v2806_v46 = vpop.f32.mrf.mxu0 }
  0xba   : > { %2006 = vmatmul.msk.f32.gmra.mxu1 %vm302_vm1, %v2583_v25  ;;  %2032 = vmatmul.msk.f32.gmra.mxu2 %vm302_vm1, %v2586_v26 }
  0xbb   : > { %2058 = vmatmul.msk.f32.gmra.mxu3 %vm302_vm1, %v2749_v2  ;;  %2084 = vmatmul.msk.f32.gmra.mxu0 %vm302_vm1, %v2809_v47 }
  0xbd   : > { %v2820_v49 = vpop.f32.mrf.mxu2 }
  0xbe   : > { %3548 = vst [vmem:[#allocation11_spill] sm:$0xff] %v2820_v49  ;;  %v2822_v51 = vpop.f32.mrf.mxu3 }
  0xbf   : > { %3549 = vst [vmem:[#allocation12_spill] sm:$0xff] %v2822_v51  ;;  %v2824_v53 = vpop.f32.mrf.mxu1 }
  0xc0   : > { %v2826_v55 = vpop.f32.mrf.mxu0 }
  0xc2   : > { %2007 = vmatmul.msk.f32.gmra.mxu1 %vm302_vm1, %v2603_v29  ;;  %2033 = vmatmul.msk.f32.gmra.mxu2 %vm302_vm1, %v2606_v30 }
  0xc3   : > { %2059 = vmatmul.msk.f32.gmra.mxu3 %vm302_vm1, %v2769_v24  ;;  %2085 = vmatmul.msk.f32.gmra.mxu0 %vm302_vm1, %v2829_v57 }
  0xc5   : > { %v2840_v61 = vpop.f32.mrf.mxu2 }
  0xc6   : > { %3550 = vst [vmem:[#allocation13_spill] sm:$0xff] %v2840_v61  ;;  %v2842_v63 = vpop.f32.mrf.mxu3 }
  0xc7   : > { %3551 = vst [vmem:[#allocation14_spill] sm:$0xff] %v2842_v63  ;;  %v2844_v3 = vpop.f32.mrf.mxu1  ;;  %v738_v63 = vrot.slane %v2606_v30, 1 }
  0xc8   : > { %v2846_v35 = vpop.f32.mrf.mxu0 }
  0xc9   : > { %v2865_v17 = vsel %vm698_vm2, %v736_v59, %v738_v63 }
  0xca   : > { %2008 = vmatmul.msk.f32.gmra.mxu1 %vm302_vm1, %v2497_v6  ;;  %2034 = vmatmul.msk.f32.gmra.mxu2 %vm302_vm1, %v2500_v7  ;;  %3554 = vst [vmem:[#allocation17_spill] sm:$0xff] %v2865_v17 }
  0xcb   : > { %2060 = vmatmul.msk.f32.gmra.mxu3 %vm302_vm1, %v2789_v40  ;;  %2086 = vmatmul.msk.f32.gmra.mxu0 %vm302_vm1, %v2849_v42 }
  0xcd   : > { %v2860_v51 = vpop.f32.mrf.mxu2 }
  0xce   : > { %3552 = vst [vmem:[#allocation15_spill] sm:$0xff] %v2860_v51  ;;  %v2862_v44 = vpop.f32.mrf.mxu3 }
  0xcf   : > { %3553 = vst [vmem:[#allocation16_spill] sm:$0xff] %v2862_v44  ;;  %v497_v48 = vpop.f32.mrf.mxu1  ;;  %v740_v44 = vrot.slane %v2500_v7, 1 }
  0xd0   : > { %v946_v37 = vpop.f32.mrf.mxu0  ;;  %v498_v51 = vadd.f32 %v497_v48, %v2746_v1 }
  0xd2   : > { %2009 = vmatmul.msk.f32.gmra.mxu1 %vm302_vm1, %v2518_v10  ;;  %2035 = vmatmul.msk.f32.gmra.mxu2 %vm302_vm1, %v2521_v11  ;;  %v2878_v10 = vsel %vm698_vm2, %v738_v63, %v740_v44 }
  0xd3   : > { %2061 = vmatmul.msk.f32.gmra.mxu3 %vm302_vm1, %v2809_v47  ;;  %2087 = vmatmul.msk.f32.gmra.mxu0 %vm302_vm1, %v2865_v17 }
  0xd5   : > { %v600_v40 = vpop.f32.mrf.mxu2 }
  0xd6   : > { %v672_v61 = vadd.f32 %v600_v40, %v498_v51  ;;  %v816_v59 = vpop.f32.mrf.mxu3  ;;  %v742_v40 = vrot.slane %v2521_v11, 1 }
  0xd7   : > { %v500_v24 = vpop.f32.mrf.mxu1 }
  0xd8   : > { %v888_v6 = vadd.f32 %v816_v59, %v672_v61  ;;  %v949_v49 = vpop.f32.mrf.mxu0  ;;  %v501_v1 = vadd.f32 %v500_v24, %v2766_v19  ;;  %v2893_v59 = vsel %vm698_vm2, %v740_v44, %v742_v40  ;;  %v744_v24 = vrot.slane %v2541_v15, 1 }
  0xda   : > { %v2880_v2 = vadd.f32 %v946_v37, %v888_v6  ;;  %2010 = vmatmul.msk.f32.gmra.mxu1 %vm302_vm1, %v2538_v14  ;;  %2036 = vmatmul.msk.f32.gmra.mxu2 %vm302_vm1, %v2541_v15 }
  0xdb   : > { %2062 = vmatmul.msk.f32.gmra.mxu3 %vm302_vm1, %v2829_v57  ;;  %2088 = vmatmul.msk.f32.gmra.mxu0 %vm302_vm1, %v2878_v10 }
  0xdc   : > { %3555 = vst [vmem:[#allocation18_spill] sm:$0xff] %v2880_v2 }
  0xdd   : > { %v603_v51 = vpop.f32.mrf.mxu2 }
  0xde   : > { %v673_v61 = vadd.f32 %v603_v51, %v501_v1  ;;  %v819_v6 = vpop.f32.mrf.mxu3 }
  0xdf   : > { %v503_v37 = vpop.f32.mrf.mxu1 }
  0xe0   : > { %v889_v63 = vadd.f32 %v819_v6, %v673_v61  ;;  %v952_v48 = vpop.f32.mrf.mxu0  ;;  %v504_v19 = vadd.f32 %v503_v37, %v2786_v39  ;;  %v746_v39 = vrot.slane %v2567_v22, 1 }
  0xe2   : > { %v2895_v2 = vadd.f32 %v949_v49, %v889_v63  ;;  %2011 = vmatmul.msk.f32.gmra.mxu1 %vm302_vm1, %v2564_v21  ;;  %2037 = vmatmul.msk.f32.gmra.mxu2 %vm302_vm1, %v2567_v22  ;;  %v2908_v63 = vsel %vm698_vm2, %v742_v40, %v744_v24  ;;  %v1176_v40 = vrot.slane %v2615_v33, 2  ;;  %v914_v33 = vrot.slane %v2589_v27, 1 }
  0xe3   : > { %2063 = vmatmul.msk.f32.gmra.mxu3 %vm302_vm1, %v2849_v42  ;;  %2089 = vmatmul.msk.f32.gmra.mxu0 %vm302_vm1, %v2893_v59 }
  0xe4   : > { %3556 = vst [vmem:[#allocation19_spill] sm:$0xff] %v2895_v2 }
  0xe5   : > { %v606_v44 = vpop.f32.mrf.mxu2 }
  0xe6   : > { %v674_v1 = vadd.f32 %v606_v44, %v504_v19  ;;  %v822_v49 = vpop.f32.mrf.mxu3 }
  0xe7   : > { %v506_v51 = vpop.f32.mrf.mxu1 }
  0xe8   : > { %v890_v61 = vadd.f32 %v822_v49, %v674_v1  ;;  %v955_v6 = vpop.f32.mrf.mxu0  ;;  %v507_v37 = vadd.f32 %v506_v51, %v2806_v46 }
  0xea   : > { %v2910_v2 = vadd.f32 %v952_v48, %v890_v61  ;;  %2012 = vmatmul.msk.f32.gmra.mxu1 %vm302_vm1, %v2586_v26  ;;  %2038 = vmatmul.msk.f32.gmra.mxu2 %vm302_vm1, %v2589_v27  ;;  %v3536_v48 = vrot.slane %v2618_v34, 2  ;;  %v916_v27 = vrot.slane %v2609_v31, 1 }
  0xeb   : > { %2064 = vmatmul.msk.f32.gmra.mxu3 %vm302_vm1, %v2865_v17  ;;  %2090 = vmatmul.msk.f32.gmra.mxu0 %vm302_vm1, %v2908_v63  ;;  %v2925_v17 = vsel %vm698_vm2, %v744_v24, %v746_v39 }
  0xec   : > { %3557 = vst [vmem:[#allocation20_spill] sm:$0xff] %v2910_v2  ;;  %v2930_v22 = vsel %vm1175_vm3, %v1176_v40, %v3536_v48 }
  0xed   : > { %v609_v19 = vpop.f32.mrf.mxu2 }
  0xee   : > { %v675_v44 = vadd.f32 %v609_v19, %v507_v37  ;;  %v825_v1 = vpop.f32.mrf.mxu3  ;;  %v2945_v19 = vld [vmem:[%s2490_s10 + $0xd8] sm:$0xff] }
  0xef   : > { %v509_v49 = vpop.f32.mrf.mxu1 }
  0xf0   : > { %v891_v61 = vadd.f32 %v825_v1, %v675_v44  ;;  %v958_v2 = vpop.f32.mrf.mxu0  ;;  %v510_v24 = vadd.f32 %v509_v49, %v2826_v55 }
  0xf2   : > { %v2932_v46 = vadd.f32 %v955_v6, %v891_v61  ;;  %2013 = vmatmul.msk.f32.gmra.mxu1 %vm302_vm1, %v2606_v30  ;;  %2039 = vmatmul.msk.f32.gmra.mxu2 %vm302_vm1, %v2609_v31  ;;  %v2948_v61 = vsel %vm698_vm2, %v746_v39, %v914_v33  ;;  %v3537_v31 = vrot.slane %v2945_v19, 1 }
  0xf3   : > { %2065 = vmatmul.msk.f32.gmra.mxu3 %vm302_vm1, %v2878_v10  ;;  %2091 = vmatmul.msk.f32.gmra.mxu0 %vm302_vm1, %v2925_v17 }
  0xf5   : > { %v612_v51 = vpop.f32.mrf.mxu2 }
  0xf6   : > { %v676_v37 = vadd.f32 %v612_v51, %v510_v24  ;;  %v828_v6 = vpop.f32.mrf.mxu3  ;;  %v2963_v51 = vld [vmem:[%s2490_s10 + $0xe0] sm:$0xff] }
  0xf7   : > { %v512_v40 = vpop.f32.mrf.mxu1 }
  0xf8   : > { %v892_v44 = vadd.f32 %v828_v6, %v676_v37  ;;  %v961_v1 = vpop.f32.mrf.mxu0  ;;  %v513_v55 = vadd.f32 %v512_v40, %v2846_v35 }
  0xfa   : > { %v2950_v48 = vadd.f32 %v958_v2, %v892_v44  ;;  %2014 = vmatmul.msk.f32.gmra.mxu1 %vm302_vm1, %v2500_v7  ;;  %2040 = vmatmul.msk.f32.gmra.mxu2 %vm302_vm1, %v2945_v19  ;;  %v2966_v44 = vsel %vm698_vm2, %v914_v33, %v916_v27 }
  0xfb   : > { %2066 = vmatmul.msk.f32.gmra.mxu3 %vm302_vm1, %v2893_v59  ;;  %2092 = vmatmul.msk.f32.gmra.mxu0 %vm302_vm1, %v2948_v61 }
  0xfc   : > { %3558 = vst [vmem:[#allocation21_spill] sm:$0xff] %v2950_v48 }
  0xfd   : > { %v615_v39 = vpop.f32.mrf.mxu2 }
  0xfe   : > { %v677_v49 = vadd.f32 %v615_v39, %v513_v55  ;;  %v831_v2 = vpop.f32.mrf.mxu3  ;;  %v2981_v39 = vld [vmem:[%s2490_s10 + $0xe8] sm:$0xff] }
  0xff   : > { %v515_v24 = vpop.f32.mrf.mxu1 }
 0x100   : > { %v893_v37 = vadd.f32 %v831_v2, %v677_v49  ;;  %v964_v6 = vpop.f32.mrf.mxu0  ;;  %v516_v35 = vadd.f32 %v515_v24, %v2744_v0  ;;  %v1181_v0 = vrot.slane %v2508_v8, 2  ;;  %v1183_v24 = vrot.slane %v2524_v12, 2 }
 0x101   : > { %v1179_v12 = vrot.slane %v2635_v41, 2 }
 0x102   : > { %v2968_v48 = vadd.f32 %v961_v1, %v893_v37  ;;  %2015 = vmatmul.msk.f32.gmra.mxu1 %vm302_vm1, %v2521_v11  ;;  %2041 = vmatmul.msk.f32.gmra.mxu2 %vm302_vm1, %v2963_v51  ;;  %v2986_v37 = vsel %vm698_vm2, %v916_v27, %v3537_v31  ;;  %v1187_v27 = vrot.slane %v2570_v23, 2  ;;  %v1184_v8 = vsel %vm1175_vm3, %v1181_v0, %v1183_v24 }
 0x103   : > { %2067 = vmatmul.msk.f32.gmra.mxu3 %vm302_vm1, %v2908_v63  ;;  %2093 = vmatmul.msk.f32.gmra.mxu0 %vm302_vm1, %v2966_v44  ;;  %3560 = vst [vmem:[#allocation23_spill] sm:$0xff] %v2986_v37  ;;  %v1185_v23 = vrot.slane %v2544_v16, 2 }
 0x104   : > { %3559 = vst [vmem:[#allocation22_spill] sm:$0xff] %v2968_v48 }
 0x105   : > { %v618_v33 = vpop.f32.mrf.mxu2  ;;  %v1186_v41 = vsel %vm1175_vm3, %v1183_v24, %v1185_v23 }
 0x106   : > { %v678_v40 = vadd.f32 %v618_v33, %v516_v35  ;;  %v834_v1 = vpop.f32.mrf.mxu3 }
 0x107   : > { %v518_v55 = vpop.f32.mrf.mxu1 }
 0x108   : > { %v894_v49 = vadd.f32 %v834_v1, %v678_v40  ;;  %v967_v2 = vpop.f32.mrf.mxu0  ;;  %v519_v35 = vadd.f32 %v518_v55, %v2764_v18  ;;  %v1191_v18 = vrot.slane %v2612_v32, 2 }
 0x10a   : > { %v2988_v48 = vadd.f32 %v964_v6, %v894_v49  ;;  %2016 = vmatmul.msk.f32.gmra.mxu1 %vm302_vm1, %v2541_v15  ;;  %2042 = vmatmul.msk.f32.gmra.mxu2 %vm302_vm1, %v2981_v39  ;;  %v1189_v6 = vrot.slane %v2592_v28, 2 }
 0x10b   : > { %2068 = vmatmul.msk.f32.gmra.mxu3 %vm302_vm1, %v2925_v17  ;;  %2094 = vmatmul.msk.f32.gmra.mxu0 %vm302_vm1, %v2986_v37 }
 0x10c   : > { %3561 = vst [vmem:[#allocation24_spill] sm:$0xff] %v2988_v48  ;;  %v3005_v48 = vsel %vm1175_vm3, %v1187_v27, %v1189_v6 }
 0x10d   : > { %v621_v15 = vpop.f32.mrf.mxu2 }
 0x10e   : > { %v679_v33 = vadd.f32 %v621_v15, %v519_v35  ;;  %v837_v40 = vpop.f32.mrf.mxu3  ;;  %v3562_v15 = vrot.slane %v2618_v34, 2  ;;  %v1193_v34 = vrot.slane %v2494_v5, 2 }
 0x10f   : > { %v521_v1 = vpop.f32.mrf.mxu1 }
 0x110   : > { %v895_v49 = vadd.f32 %v837_v40, %v679_v33  ;;  %v970_v31 = vpop.f32.mrf.mxu0  ;;  %v522_v28 = vadd.f32 %v521_v1, %v2784_v38 }
 0x112   : > { %v3007_v37 = vadd.f32 %v967_v2, %v895_v49  ;;  %2097 = vmatmul.msk.f32.vlgmr.msra.gmra.mxu1 %vm302_vm1, %v2664_v50  ;;  %2123 = vmatmul.msk.f32.vlgmr.msra.gmra.mxu2 %vm302_vm1, %v2930_v22  ;;  %v1180_v22 = vsel %vm1175_vm3, %v3562_v15, %v1179_v12  ;;  %v3025_v49 = vsel %vm1175_vm3, %v1189_v6, %v1191_v18 }
 0x113   : > { %2149 = vmatmul.msk.f32.vlgmr.msra.gmra.mxu3 %vm302_vm1, %v1184_v8  ;;  %2175 = vmatmul.msk.f32.vlgmr.msra.gmra.mxu0 %vm302_vm1, %v3005_v48 }
 0x115   : > { %v624_v55 = vpop.f32.mrf.mxu2 }
 0x116   : > { %v680_v2 = vadd.f32 %v624_v55, %v522_v28  ;;  %v840_v35 = vpop.f32.mrf.mxu3 }
 0x117   : > { %v524_v50 = vpop.f32.mrf.mxu1 }
 0x118   : > { %v896_v33 = vadd.f32 %v840_v35, %v680_v2  ;;  %v973_v40 = vpop.f32.mrf.mxu0  ;;  %v525_v32 = vadd.f32 %v524_v50, %v2804_v45  ;;  %v3040_v2 = vsel %vm1175_vm3, %v1191_v18, %v1193_v34  ;;  %v1195_v45 = vrot.slane %v2515_v9, 2 }
 0x11a   : > { %v3027_v16 = vadd.f32 %v970_v31, %v896_v33  ;;  %2098 = vmatmul.msk.f32.gmra.mxu1 %vm302_vm1, %v2675_v52  ;;  %2124 = vmatmul.msk.f32.gmra.mxu2 %vm302_vm1, %v1180_v22  ;;  %v1182_v31 = vsel %vm1175_vm3, %v1179_v12, %v1181_v0  ;;  %v1188_v52 = vsel %vm1175_vm3, %v1185_v23, %v1187_v27 }
 0x11b   : > { %2150 = vmatmul.msk.f32.gmra.mxu3 %vm302_vm1, %v1186_v41  ;;  %2176 = vmatmul.msk.f32.gmra.mxu0 %vm302_vm1, %v3025_v49  ;;  %v3053_v15 = vsel %vm1175_vm3, %v1193_v34, %v1195_v45 }
 0x11d   : > { %v627_v38 = vpop.f32.mrf.mxu2 }
 0x11e   : > { %v681_v24 = vadd.f32 %v627_v38, %v525_v32  ;;  %v843_v6 = vpop.f32.mrf.mxu3 }
 0x11f   : > { %v527_v1 = vpop.f32.mrf.mxu1 }
 0x120   : > { %v897_v28 = vadd.f32 %v843_v6, %v681_v24  ;;  %v976_v55 = vpop.f32.mrf.mxu0  ;;  %v528_v5 = vadd.f32 %v527_v1, %v2824_v53  ;;  %v1197_v53 = vrot.slane %v2535_v13, 2 }
 0x122   : > { %v3042_v35 = vadd.f32 %v973_v40, %v897_v28  ;;  %2099 = vmatmul.msk.f32.gmra.mxu1 %vm302_vm1, %v2686_v54  ;;  %2125 = vmatmul.msk.f32.gmra.mxu2 %vm302_vm1, %v1182_v31 }
 0x123   : > { %2151 = vmatmul.msk.f32.gmra.mxu3 %vm302_vm1, %v1188_v52  ;;  %2177 = vmatmul.msk.f32.gmra.mxu0 %vm302_vm1, %v3040_v2 }
 0x125   : > { %v630_v0 = vpop.f32.mrf.mxu2 }
 0x126   : > { %v682_v27 = vadd.f32 %v630_v0, %v528_v5  ;;  %v846_v12 = vpop.f32.mrf.mxu3 }
 0x127   : > { %v530_v23 = vpop.f32.mrf.mxu1 }
 0x128   : > { %v898_v18 = vadd.f32 %v846_v12, %v682_v27  ;;  %v979_v50 = vpop.f32.mrf.mxu0  ;;  %v531_v9 = vadd.f32 %v530_v23, %v2844_v3  ;;  %v1199_v3 = vrot.slane %v2561_v20, 2 }
 0x12a   : > { %v3055_v54 = vadd.f32 %v976_v55, %v898_v18  ;;  %2100 = vmatmul.msk.f32.gmra.mxu1 %vm302_vm1, %v2697_v56  ;;  %2126 = vmatmul.msk.f32.gmra.mxu2 %vm302_vm1, %v1184_v8  ;;  %v3067_v56 = vsel %vm1175_vm3, %v1195_v45, %v1197_v53 }
 0x12b   : > { %2152 = vmatmul.msk.f32.gmra.mxu3 %vm302_vm1, %v3005_v48  ;;  %2178 = vmatmul.msk.f32.gmra.mxu0 %vm302_vm1, %v3053_v15 }
 0x12d   : > { %v633_v22 = vpop.f32.mrf.mxu2 }
 0x12e   : > { %v683_v33 = vadd.f32 %v633_v22, %v531_v9  ;;  %v849_v40 = vpop.f32.mrf.mxu3 }
 0x12f   : > { %v533_v32 = vpop.f32.mrf.mxu1 }
 0x130   : > { %v899_v34 = vadd.f32 %v849_v40, %v683_v33  ;;  %v982_v38 = vpop.f32.mrf.mxu0  ;;  %v534_v13 = vadd.f32 %v533_v32, %v2760_v4  ;;  %v1201_v4 = vrot.slane %v2583_v25, 2  ;;  %v3563_v40 = vld [vmem:[#allocation5_spill] sm:$0xff]  ;;  %v3565_v32 = vld [vmem:[#allocation3_spill] sm:$0xff] }
 0x132   : > { %v3069_v8 = vadd.f32 %v979_v50, %v899_v34  ;;  %2101 = vmatmul.msk.f32.gmra.mxu1 %vm302_vm1, %v2709_v58  ;;  %2127 = vmatmul.msk.f32.gmra.mxu2 %vm302_vm1, %v1186_v41  ;;  %v3081_v58 = vsel %vm1175_vm3, %v1197_v53, %v1199_v3  ;;  %v1205_v34 = vrot.slane %v3565_v32, 2 }
 0x133   : > { %2153 = vmatmul.msk.f32.gmra.mxu3 %vm302_vm1, %v3025_v49  ;;  %2179 = vmatmul.msk.f32.gmra.mxu0 %vm302_vm1, %v3067_v56 }
 0x135   : > { %v636_v24 = vpop.f32.mrf.mxu2 }
 0x136   : > { %v684_v6 = vadd.f32 %v636_v24, %v534_v13  ;;  %v852_v1 = vpop.f32.mrf.mxu3 }
 0x137   : > { %v536_v31 = vpop.f32.mrf.mxu1 }
 0x138   : > { %v900_v28 = vadd.f32 %v852_v1, %v684_v6  ;;  %v985_v55 = vpop.f32.mrf.mxu0  ;;  %v537_v20 = vadd.f32 %v536_v31, %v2780_v36  ;;  %v1203_v36 = vrot.slane %v2603_v29, 2  ;;  %v3564_v29 = vld [vmem:[#allocation11_spill] sm:$0xff] }
 0x13a   : > { %v3083_v41 = vadd.f32 %v982_v38, %v900_v28  ;;  %2102 = vmatmul.msk.f32.gmra.mxu1 %vm302_vm1, %v2721_v60  ;;  %2128 = vmatmul.msk.f32.gmra.mxu2 %vm302_vm1, %v1188_v52  ;;  %v3095_v60 = vsel %vm1175_vm3, %v1199_v3, %v1201_v4  ;;  %v3125_v31 = vsel %vm1175_vm3, %v1203_v36, %v1205_v34  ;;  %v3566_v28 = vld [vmem:[#allocation7_spill] sm:$0xff] }
 0x13b   : > { %2154 = vmatmul.msk.f32.gmra.mxu3 %vm302_vm1, %v3040_v2  ;;  %2180 = vmatmul.msk.f32.gmra.mxu0 %vm302_vm1, %v3081_v58 }
 0x13d   : > { %v639_v5 = vpop.f32.mrf.mxu2 }
 0x13e   : > { %v685_v45 = vadd.f32 %v639_v5, %v537_v20  ;;  %v855_v0 = vpop.f32.mrf.mxu3 }
 0x13f   : > { %v539_v27 = vpop.f32.mrf.mxu1 }
 0x140   : > { %v901_v12 = vadd.f32 %v855_v0, %v685_v45  ;;  %v988_v23 = vpop.f32.mrf.mxu0  ;;  %v540_v25 = vadd.f32 %v539_v27, %v2800_v43 }
 0x142   : > { %v3097_v52 = vadd.f32 %v985_v55, %v901_v12  ;;  %2103 = vmatmul.msk.f32.gmra.mxu1 %vm302_vm1, %v2733_v62  ;;  %2129 = vmatmul.msk.f32.gmra.mxu2 %vm302_vm1, %v3005_v48  ;;  %v3110_v62 = vsel %vm1175_vm3, %v1201_v4, %v1203_v36  ;;  %v3567_v55 = vld [vmem:[#allocation13_spill] sm:$0xff]  ;;  %v3568_v4 = vld [vmem:[#allocation4_spill] sm:$0xff] }
 0x143   : > { %2155 = vmatmul.msk.f32.gmra.mxu3 %vm302_vm1, %v3053_v15  ;;  %2181 = vmatmul.msk.f32.gmra.mxu0 %vm302_vm1, %v3095_v60  ;;  %v1207_v5 = vrot.slane %v3568_v4, 2  ;;  %v1213_v4 = vrot.slane %v2586_v26, 2  ;;  %v3573_v26 = vld [vmem:[#allocation10_spill] sm:$0xff] }
 0x145   : > { %v642_v18 = vpop.f32.mrf.mxu2  ;;  %v3140_v36 = vsel %vm1175_vm3, %v1205_v34, %v1207_v5 }
 0x146   : > { %v686_v50 = vadd.f32 %v642_v18, %v540_v25  ;;  %v858_v9 = vpop.f32.mrf.mxu3  ;;  %v3569_v18 = vld [vmem:[#allocation9_spill] sm:$0xff] }
 0x147   : > { %v542_v53 = vpop.f32.mrf.mxu1 }
 0x148   : > { %v902_v22 = vadd.f32 %v858_v9, %v686_v50  ;;  %v991_v33 = vpop.f32.mrf.mxu0  ;;  %v543_v43 = vadd.f32 %v542_v53, %v3564_v29  ;;  %v3570_v50 = vld [vmem:[#allocation15_spill] sm:$0xff]  ;;  %v1209_v53 = vrot.slane %v2538_v14, 2  ;;  %v3571_v14 = vld [vmem:[#allocation6_spill] sm:$0xff] }
 0x14a   : > { %v3112_v48 = vadd.f32 %v988_v23, %v902_v22  ;;  %2104 = vmatmul.msk.f32.gmra.mxu1 %vm302_vm1, %v3563_v40  ;;  %2130 = vmatmul.msk.f32.gmra.mxu2 %vm302_vm1, %v3025_v49  ;;  %v3155_v34 = vsel %vm1175_vm3, %v1207_v5, %v1209_v53 }
 0x14b   : > { %2156 = vmatmul.msk.f32.gmra.mxu3 %vm302_vm1, %v3067_v56  ;;  %2182 = vmatmul.msk.f32.gmra.mxu0 %vm302_vm1, %v3110_v62 }
 0x14d   : > { %v645_v38 = vpop.f32.mrf.mxu2 }
 0x14e   : > { %v687_v13 = vadd.f32 %v645_v38, %v543_v43  ;;  %v861_v3 = vpop.f32.mrf.mxu3 }
 0x14f   : > { %v545_v24 = vpop.f32.mrf.mxu1 }
 0x150   : > { %v903_v6 = vadd.f32 %v861_v3, %v687_v13  ;;  %v994_v1 = vpop.f32.mrf.mxu0  ;;  %v546_v20 = vadd.f32 %v545_v24, %v3567_v55  ;;  %v1211_v13 = vrot.slane %v2564_v21, 2  ;;  %v3572_v21 = vld [vmem:[#allocation8_spill] sm:$0xff] }
 0x152   : > { %v3127_v49 = vadd.f32 %v991_v33, %v903_v6  ;;  %2105 = vmatmul.msk.f32.gmra.mxu1 %vm302_vm1, %v3566_v28  ;;  %2131 = vmatmul.msk.f32.gmra.mxu2 %vm302_vm1, %v3040_v2 }
 0x153   : > { %2157 = vmatmul.msk.f32.gmra.mxu3 %vm302_vm1, %v3081_v58  ;;  %2183 = vmatmul.msk.f32.gmra.mxu0 %vm302_vm1, %v3125_v31 }
 0x155   : > { %v648_v45 = vpop.f32.mrf.mxu2 }
 0x156   : > { %v688_v0 = vadd.f32 %v648_v45, %v546_v20  ;;  %v864_v27 = vpop.f32.mrf.mxu3 }
 0x157   : > { %v548_v12 = vpop.f32.mrf.mxu1 }
 0x158   : > { %v904_v23 = vadd.f32 %v864_v27, %v688_v0  ;;  %v997_v25 = vpop.f32.mrf.mxu0  ;;  %v549_v9 = vadd.f32 %v548_v12, %v3570_v50 }
 0x15a   : > { %v3142_v2 = vadd.f32 %v994_v1, %v904_v23  ;;  %2106 = vmatmul.msk.f32.gmra.mxu1 %vm302_vm1, %v3569_v18  ;;  %2132 = vmatmul.msk.f32.gmra.mxu2 %vm302_vm1, %v3053_v15  ;;  %v1215_v18 = vrot.slane %v2606_v30, 2  ;;  %v3575_v30 = vld [vmem:[#allocation12_spill] sm:$0xff] }
 0x15b   : > { %2158 = vmatmul.msk.f32.gmra.mxu3 %vm302_vm1, %v3095_v60  ;;  %2184 = vmatmul.msk.f32.gmra.mxu0 %vm302_vm1, %v3140_v36 }
 0x15d   : > { %v651_v22 = vpop.f32.mrf.mxu2 }
 0x15e   : > { %v689_v33 = vadd.f32 %v651_v22, %v549_v9  ;;  %v867_v40 = vpop.f32.mrf.mxu3 }
 0x15f   : > { %v551_v29 = vpop.f32.mrf.mxu1 }
 0x160   : > { %v905_v43 = vadd.f32 %v867_v40, %v689_v33  ;;  %v1000_v32 = vpop.f32.mrf.mxu0  ;;  %v552_v38 = vadd.f32 %v551_v29, %v3571_v14  ;;  %v3574_v29 = vld [vmem:[#allocation17_spill] sm:$0xff] }
 0x162   : > { %v3157_v15 = vadd.f32 %v997_v25, %v905_v43  ;;  %2107 = vmatmul.msk.f32.gmra.mxu1 %vm302_vm1, %v2809_v47  ;;  %2133 = vmatmul.msk.f32.gmra.mxu2 %vm302_vm1, %v3067_v56  ;;  %v3170_v47 = vsel %vm1175_vm3, %v1209_v53, %v1211_v13 }
 0x163   : > { %2159 = vmatmul.msk.f32.gmra.mxu3 %vm302_vm1, %v3110_v62  ;;  %2185 = vmatmul.msk.f32.gmra.mxu0 %vm302_vm1, %v3155_v34 }
 0x165   : > { %v654_v3 = vpop.f32.mrf.mxu2 }
 0x166   : > { %v690_v24 = vadd.f32 %v654_v3, %v552_v38  ;;  %v870_v6 = vpop.f32.mrf.mxu3 }
 0x167   : > { %v554_v1 = vpop.f32.mrf.mxu1 }
 0x168   : > { %v906_v28 = vadd.f32 %v870_v6, %v690_v24  ;;  %v1003_v55 = vpop.f32.mrf.mxu0  ;;  %v555_v20 = vadd.f32 %v554_v1, %v3572_v21 }
 0x16a   : > { %v3172_v56 = vadd.f32 %v1000_v32, %v906_v28  ;;  %2108 = vmatmul.msk.f32.gmra.mxu1 %vm302_vm1, %v2829_v57  ;;  %2134 = vmatmul.msk.f32.gmra.mxu2 %vm302_vm1, %v3081_v58  ;;  %v3185_v57 = vsel %vm1175_vm3, %v1211_v13, %v1213_v4  ;;  %v1217_v32 = vrot.slane %v2500_v7, 2  ;;  %v3576_v7 = vld [vmem:[#allocation14_spill] sm:$0xff] }
 0x16b   : > { %2160 = vmatmul.msk.f32.gmra.mxu3 %vm302_vm1, %v3125_v31  ;;  %2186 = vmatmul.msk.f32.gmra.mxu0 %vm302_vm1, %v3170_v47 }
 0x16c   : > { %v3215_v1 = vsel %vm1175_vm3, %v1215_v18, %v1217_v32 }
 0x16d   : > { %v657_v5 = vpop.f32.mrf.mxu2 }
 0x16e   : > { %v691_v45 = vadd.f32 %v657_v5, %v555_v20  ;;  %v873_v0 = vpop.f32.mrf.mxu3 }
 0x16f   : > { %v557_v27 = vpop.f32.mrf.mxu1 }
 0x170   : > { %v907_v12 = vadd.f32 %v873_v0, %v691_v45  ;;  %v1006_v23 = vpop.f32.mrf.mxu0  ;;  %v558_v25 = vadd.f32 %v557_v27, %v3573_v26 }
 0x172   : > { %v3187_v58 = vadd.f32 %v1003_v55, %v907_v12  ;;  %2109 = vmatmul.msk.f32.gmra.mxu1 %vm302_vm1, %v2849_v42  ;;  %2135 = vmatmul.msk.f32.gmra.mxu2 %vm302_vm1, %v3095_v60  ;;  %v3200_v42 = vsel %vm1175_vm3, %v1213_v4, %v1215_v18  ;;  %v1219_v55 = vrot.slane %v2521_v11, 2  ;;  %v3577_v11 = vld [vmem:[#allocation16_spill] sm:$0xff]  ;;  %v2287_v12 = vld [vmem:[%s2490_s10 + $0xb8] sm:$0xff] }
 0x173   : > { %2161 = vmatmul.msk.f32.gmra.mxu3 %vm302_vm1, %v3140_v36  ;;  %2187 = vmatmul.msk.f32.gmra.mxu0 %vm302_vm1, %v3185_v57 }
 0x174   : > { %v3230_v0 = vsel %vm1175_vm3, %v1217_v32, %v1219_v55 }
 0x175   : > { %v660_v50 = vpop.f32.mrf.mxu2 }
 0x176   : > { %v692_v9 = vadd.f32 %v660_v50, %v558_v25  ;;  %v876_v53 = vpop.f32.mrf.mxu3 }
 0x177   : > { %v560_v22 = vpop.f32.mrf.mxu1 }
 0x178   : > { %v908_v33 = vadd.f32 %v876_v53, %v692_v9  ;;  %v1009_v40 = vpop.f32.mrf.mxu0  ;;  %v561_v43 = vadd.f32 %v560_v22, %v3575_v30  ;;  %v2288_v22 = vld [vmem:[%s2490_s10 + $0xc0] sm:$0xff] }
 0x17a   : > { %v3202_v60 = vadd.f32 %v1006_v23, %v908_v33  ;;  %2110 = vmatmul.msk.f32.gmra.mxu1 %vm302_vm1, %v3574_v29  ;;  %2136 = vmatmul.msk.f32.gmra.mxu2 %vm302_vm1, %v3110_v62  ;;  %v1221_v23 = vrot.slane %v2287_v12, 2  ;;  %v1223_v33 = vrot.slane %v2288_v22, 2  ;;  %v1395_v12 = vrot.slane %v2945_v19, 2 }
 0x17b   : > { %2162 = vmatmul.msk.f32.gmra.mxu3 %vm302_vm1, %v3155_v34  ;;  %2188 = vmatmul.msk.f32.gmra.mxu0 %vm302_vm1, %v3200_v42 }
 0x17d   : > { %v663_v14 = vpop.f32.mrf.mxu2 }
 0x17e   : > { %v693_v38 = vadd.f32 %v663_v14, %v561_v43  ;;  %v879_v13 = vpop.f32.mrf.mxu3 }
 0x17f   : > { %v563_v3 = vpop.f32.mrf.mxu1 }
 0x180   : > { %v909_v24 = vadd.f32 %v879_v13, %v693_v38  ;;  %v1012_v6 = vpop.f32.mrf.mxu0  ;;  %v564_v28 = vadd.f32 %v563_v3, %v3576_v7  ;;  %v3268_v13 = vsel %vm1175_vm3, %v1221_v23, %v1223_v33  ;;  %v3579_v7 = vld [vmem:[#allocation19_spill] sm:$0xff] }
 0x182   : > { %v3217_v62 = vadd.f32 %v1009_v40, %v909_v24  ;;  %2111 = vmatmul.msk.f32.gmra.mxu1 %vm302_vm1, %v2878_v10  ;;  %2137 = vmatmul.msk.f32.gmra.mxu2 %vm302_vm1, %v3125_v31  ;;  %v3578_v40 = vld [vmem:[#allocation18_spill] sm:$0xff]  ;;  %v2289_v24 = vld [vmem:[%s2490_s10 + $0xc8] sm:$0xff] }
 0x183   : > { %2163 = vmatmul.msk.f32.gmra.mxu3 %vm302_vm1, %v3170_v47  ;;  %2189 = vmatmul.msk.f32.gmra.mxu0 %vm302_vm1, %v3215_v1 }
 0x185   : > { %v666_v21 = vpop.f32.mrf.mxu2 }
 0x186   : > { %v694_v20 = vadd.f32 %v666_v21, %v564_v28  ;;  %v882_v4 = vpop.f32.mrf.mxu3  ;;  %v1047_v21 = vrot.slane %v2981_v39, 1 }
 0x187   : > { %v566_v5 = vpop.f32.mrf.mxu1 }
 0x188   : > { %v910_v45 = vadd.f32 %v882_v4, %v694_v20  ;;  %v1015_v10 = vpop.f32.mrf.mxu0  ;;  %v567_v27 = vadd.f32 %v566_v5, %v3577_v11  ;;  %v1045_v4 = vrot.slane %v2963_v51, 1  ;;  %v1521_v5 = vrot.slane %v2963_v51, 2 }
 0x18a   : > { %v3232_v31 = vadd.f32 %v1012_v6, %v910_v45  ;;  %2112 = vmatmul.msk.f32.gmra.mxu1 %vm302_vm1, %v2893_v59  ;;  %2138 = vmatmul.msk.f32.gmra.mxu2 %vm302_vm1, %v3140_v36  ;;  %v3245_v36 = vsel %vm1175_vm3, %v1219_v55, %v1221_v23  ;;  %v1391_v6 = vrot.slane %v2289_v24, 2  ;;  %v3293_v23 = vsel %vm698_vm2, %v1045_v4, %v1047_v21 }
 0x18b   : > { %2164 = vmatmul.msk.f32.gmra.mxu3 %vm302_vm1, %v3185_v57  ;;  %2190 = vmatmul.msk.f32.gmra.mxu0 %vm302_vm1, %v3230_v0  ;;  %v1522_v51 = vsel %vm1175_vm3, %v1395_v12, %v1521_v5 }
 0x18d   : > { %v669_v26 = vpop.f32.mrf.mxu2 }
 0x18e   : > { %v695_v25 = vadd.f32 %v669_v26, %v567_v27  ;;  %v885_v18 = vpop.f32.mrf.mxu3  ;;  %v1392_v27 = vsel %vm1175_vm3, %v1223_v33, %v1391_v6 }
 0x18f   : > { %v1077_v50 = vpop.f32.mrf.mxu1 }
 0x190   : > { %v911_v59 = vadd.f32 %v885_v18, %v695_v25  ;;  %v1553_v9 = vpop.f32.mrf.mxu0  ;;  %v1149_v29 = vadd.f32 %v1077_v50, %v3578_v40  ;;  %v2290_v25 = vld [vmem:[%s2490_s10 + $0xd0] sm:$0xff]  ;;  %v3580_v50 = vld [vmem:[#allocation20_spill] sm:$0xff] }
 0x191   : > { %v1393_v18 = vrot.slane %v2290_v25, 2 }
 0x192   : > { %v3247_v53 = vadd.f32 %v1015_v10, %v911_v59  ;;  %2113 = vmatmul.msk.f32.gmra.mxu1 %vm302_vm1, %v2908_v63  ;;  %2139 = vmatmul.msk.f32.gmra.mxu2 %vm302_vm1, %v3155_v34  ;;  %v3265_v63 = vld [vmem:[%s266_s11] ss:$0 sm:$0xff]  ;;  %s2212_s11 = smul.u32 (%p2442_p6), 48, %s2341_s15 }
 0x193   : > { %2165 = vmatmul.msk.f32.gmra.mxu3 %vm302_vm1, %v3200_v42  ;;  %2191 = vmatmul.msk.f32.gmra.mxu0 %vm302_vm1, %v3245_v36 }
 0x194   : > { %s1713_s30 = sadd.s32 (%p2442_p6), %s2212_s11, %s2211_s6 }
 0x195   : > { %v1293_v30 = vpop.f32.mrf.mxu2  ;;  %s1715_s4 = sadd.s32 (%p2442_p6), %s2213_s29, %s1713_s30 }
 0x196   : > { %v1365_v43 = vadd.f32 %v1293_v30, %v1149_v29  ;;  %v1423_v32 = vpop.f32.mrf.mxu3  ;;  %s2201_s25 = sshll.u32 (%p2442_p6), %s1715_s4, 3 }
 0x197   : > { %v1080_v14 = vpop.f32.mrf.mxu1  ;;  %s3451_s9 = scalar_lea.vmem (%p2442_p6), %s3529_s3, %s2201_s25 }
 0x198   : > { %v1495_v34 = vadd.f32 %v1423_v32, %v1365_v43  ;;  %v1556_v38 = vpop.f32.mrf.mxu0  ;;  %v1150_v28 = vadd.f32 %v1080_v14, %v3579_v7  ;;  %v1394_v43 = vsel %vm1175_vm3, %v1391_v6, %v1393_v18 }
 0x19a   : > { %v1625_v3 = vadd.f32 %v1553_v9, %v1495_v34  ;;  %2114 = vmatmul.msk.f32.gmra.mxu1 %vm302_vm1, %v2925_v17  ;;  %2140 = vmatmul.msk.f32.gmra.mxu2 %vm302_vm1, %v3170_v47 }
 0x19b   : > { %2166 = vmatmul.msk.f32.gmra.mxu3 %vm302_vm1, %v3215_v1  ;;  %2192 = vmatmul.msk.f32.gmra.mxu0 %vm302_vm1, %v3268_v13 }
 0x19c   : > { %v1653_v55 = vadd.f32 %v3265_v63, %v1625_v3 }
 0x19d   : > { %v1296_v20 = vpop.f32.mrf.mxu2 }
 0x19e   : > { %1678 = vst.msk [vmem:[%s3282_s12] sm:$0xff] %vm1677_vm4, %v1653_v55  ;;  %v1366_v17 = vadd.f32 %v1296_v20, %v1150_v28  ;;  %v1426_v47 = vpop.f32.mrf.mxu3  ;;  %v1396_v28 = vsel %vm1175_vm3, %v1393_v18, %v1395_v12  ;;  %v3581_v20 = vld [vmem:[#allocation23_spill] sm:$0xff]  ;;  %v3583_v12 = vrot.slane %v2945_v19, 1 }
 0x19f   : > { %v1083_v45 = vpop.f32.mrf.mxu1 }
 0x1a0   : > { %v1496_v10 = vadd.f32 %v1426_v47, %v1366_v17  ;;  %v1559_v11 = vpop.f32.mrf.mxu0  ;;  %v1151_v59 = vadd.f32 %v1083_v45, %v3580_v50  ;;  %v3584_v50 = vld [vmem:[#allocation22_spill] sm:$0xff] }
 0x1a2   : > { %v1626_v26 = vadd.f32 %v1556_v38, %v1496_v10  ;;  %2115 = vmatmul.msk.f32.gmra.mxu1 %vm302_vm1, %v2948_v61  ;;  %2141 = vmatmul.msk.f32.gmra.mxu2 %vm302_vm1, %v3185_v57  ;;  %v1523_v57 = vrot.slane %v2981_v39, 2 }
 0x1a3   : > { %2167 = vmatmul.msk.f32.gmra.mxu3 %vm302_vm1, %v3230_v0  ;;  %2193 = vmatmul.msk.f32.gmra.mxu0 %vm302_vm1, %v1392_v27 }
 0x1a4   : > { %v1654_v9 = vadd.f32 %v3265_v63, %v1626_v26  ;;  %v1524_v14 = vsel %vm1175_vm3, %v1521_v5, %v1523_v57 }
 0x1a5   : > { %v1299_v22 = vpop.f32.mrf.mxu2 }
 0x1a6   : > { %1679 = vst.msk [vmem:[%s3282_s12 + $0x8] sm:$0xff] %vm1677_vm4, %v1654_v9  ;;  %v1367_v61 = vadd.f32 %v1299_v22, %v1151_v59  ;;  %v1429_v33 = vpop.f32.mrf.mxu3 }
 0x1a7   : > { %v1086_v40 = vpop.f32.mrf.mxu1 }
 0x1a8   : > { %v1497_v29 = vadd.f32 %v1429_v33, %v1367_v61  ;;  %v1562_v30 = vpop.f32.mrf.mxu0  ;;  %v1152_v34 = vadd.f32 %v1086_v40, %v2932_v46  ;;  %v3582_v46 = vld [vmem:[#allocation21_spill] sm:$0xff] }
 0x1aa   : > { %v1627_v32 = vadd.f32 %v1559_v11, %v1497_v29  ;;  %2116 = vmatmul.msk.f32.gmra.mxu1 %vm302_vm1, %v2966_v44  ;;  %2142 = vmatmul.msk.f32.gmra.mxu2 %vm302_vm1, %v3200_v42  ;;  %v298_v29 = vld [vmem:[%s2490_s10 + $0xf0] sm:$0xff] }
 0x1ab   : > { %2168 = vmatmul.msk.f32.gmra.mxu3 %vm302_vm1, %v3245_v36  ;;  %2194 = vmatmul.msk.f32.gmra.mxu0 %vm302_vm1, %v1394_v43 }
 0x1ac   : > { %v1655_v38 = vadd.f32 %v3265_v63, %v1627_v32 }
 0x1ad   : > { %v1302_v3 = vpop.f32.mrf.mxu2 }
 0x1ae   : > { %1680 = vst.msk [vmem:[%s3282_s12 + $0x10] sm:$0xff] %vm1677_vm4, %v1655_v38  ;;  %v1368_v44 = vadd.f32 %v1302_v3, %v1152_v34  ;;  %v1432_v24 = vpop.f32.mrf.mxu3  ;;  %v1525_v34 = vrot.slane %v298_v29, 2 }
 0x1af   : > { %v1089_v42 = vpop.f32.mrf.mxu1 }
 0x1b0   : > { %v1498_v6 = vadd.f32 %v1432_v24, %v1368_v44  ;;  %v1565_v7 = vpop.f32.mrf.mxu0  ;;  %v1153_v17 = vadd.f32 %v1089_v42, %v3582_v46 }
 0x1b2   : > { %v1628_v55 = vadd.f32 %v1562_v30, %v1498_v6  ;;  %2117 = vmatmul.msk.f32.gmra.mxu1 %vm302_vm1, %v3581_v20  ;;  %2143 = vmatmul.msk.f32.gmra.mxu2 %vm302_vm1, %v3215_v1  ;;  %v1046_v1 = vsel %vm698_vm2, %v3583_v12, %v1045_v4 }
 0x1b3   : > { %2169 = vmatmul.msk.f32.gmra.mxu3 %vm302_vm1, %v3268_v13  ;;  %2195 = vmatmul.msk.f32.gmra.mxu0 %vm302_vm1, %v1396_v28 }
 0x1b4   : > { %v1656_v47 = vadd.f32 %v3265_v63, %v1628_v55 }
 0x1b5   : > { %v1305_v5 = vpop.f32.mrf.mxu2 }
 0x1b6   : > { %1681 = vst.msk [vmem:[%s3282_s12 + $0x18] sm:$0xff] %vm1677_vm4, %v1656_v47  ;;  %v1369_v45 = vadd.f32 %v1305_v5, %v1153_v17  ;;  %v1435_v10 = vpop.f32.mrf.mxu3 }
 0x1b7   : > { %v1092_v11 = vpop.f32.mrf.mxu1 }
 0x1b8   : > { %v1499_v26 = vadd.f32 %v1435_v10, %v1369_v45  ;;  %v1568_v25 = vpop.f32.mrf.mxu0  ;;  %v1154_v59 = vadd.f32 %v1092_v11, %v3584_v50 }
 0x1ba   : > { %v1629_v18 = vadd.f32 %v1565_v7, %v1499_v26  ;;  %2118 = vmatmul.msk.f32.gmra.mxu1 %vm302_vm1, %v1046_v1  ;;  %2144 = vmatmul.msk.f32.gmra.mxu2 %vm302_vm1, %v3230_v0  ;;  %v1049_v0 = vrot.slane %v298_v29, 1 }
 0x1bb   : > { %2170 = vmatmul.msk.f32.gmra.mxu3 %vm302_vm1, %v1392_v27  ;;  %2196 = vmatmul.msk.f32.gmra.mxu0 %vm302_vm1, %v1522_v51  ;;  %v3585_v27 = vld [vmem:[#allocation24_spill] sm:$0xff] }
 0x1bc   : > { %v1657_v9 = vadd.f32 %v3265_v63, %v1629_v18 }
 0x1bd   : > { %v1308_v19 = vpop.f32.mrf.mxu2 }
 0x1be   : > { %1682 = vst.msk [vmem:[%s3282_s12 + $0x20] sm:$0xff] %vm1677_vm4, %v1657_v9  ;;  %v1370_v4 = vadd.f32 %v1308_v19, %v1154_v59  ;;  %v1438_v22 = vpop.f32.mrf.mxu3 }
 0x1bf   : > { %v1095_v61 = vpop.f32.mrf.mxu1 }
 0x1c0   : > { %v1500_v33 = vadd.f32 %v1438_v22, %v1370_v4  ;;  %v1571_v40 = vpop.f32.mrf.mxu0  ;;  %v1155_v51 = vadd.f32 %v1095_v61, %v3585_v27 }
 0x1c2   : > { %v1630_v30 = vadd.f32 %v1568_v25, %v1500_v33  ;;  %2119 = vmatmul.msk.f32.gmra.mxu1 %vm302_vm1, %v3293_v23  ;;  %2145 = vmatmul.msk.f32.gmra.mxu2 %vm302_vm1, %v3245_v36  ;;  %v1050_v36 = vsel %vm698_vm2, %v1047_v21, %v1049_v0 }
 0x1c3   : > { %2171 = vmatmul.msk.f32.gmra.mxu3 %vm302_vm1, %v1394_v43  ;;  %2197 = vmatmul.msk.f32.gmra.mxu0 %vm302_vm1, %v1524_v14  ;;  %v1526_v14 = vsel %vm1175_vm3, %v1523_v57, %v1525_v34 }
 0x1c4   : > { %v1658_v32 = vadd.f32 %v3265_v63, %v1630_v30 }
 0x1c5   : > { %v1311_v38 = vpop.f32.mrf.mxu2 }
 0x1c6   : > { %1683 = vst.msk [vmem:[%s3282_s12 + $0x28] sm:$0xff] %vm1677_vm4, %v1658_v32  ;;  %v1371_v3 = vadd.f32 %v1311_v38, %v1155_v51  ;;  %v1441_v44 = vpop.f32.mrf.mxu3 }
 0x1c7   : > { %v1098_v23 = vpop.f32.mrf.mxu1 }
 0x1c8   : > { %v1501_v43 = vadd.f32 %v1441_v44, %v1371_v3  ;;  %v1574_v24 = vpop.f32.mrf.mxu0  ;;  %v1156_v6 = vadd.f32 %v1098_v23, %v3007_v37 }
 0x1ca   : > { %v1631_v42 = vadd.f32 %v1571_v40, %v1501_v43  ;;  %2120 = vmatmul.msk.f32.gmra.mxu1 %vm302_vm1, %v1050_v36  ;;  %2146 = vmatmul.msk.f32.gmra.mxu2 %vm302_vm1, %v3268_v13 }
 0x1cb   : > { %2172 = vmatmul.msk.f32.gmra.mxu3 %vm302_vm1, %v1396_v28  ;;  %2198 = vmatmul.msk.f32.gmra.mxu0 %vm302_vm1, %v1526_v14 }
 0x1cc   : > { %v1659_v21 = vadd.f32 %v3265_v63, %v1631_v42 }
 0x1cd   : > { %v1314_v7 = vpop.f32.mrf.mxu2 }
 0x1ce   : > { %1684 = vst.msk [vmem:[%s3282_s12 + $0x30] sm:$0xff] %vm1677_vm4, %v1659_v21  ;;  %v1372_v39 = vadd.f32 %v1314_v7, %v1156_v6  ;;  %v1444_v57 = vpop.f32.mrf.mxu3 }
 0x1cf   : > { %v1101_v55 = vpop.f32.mrf.mxu1 }
 0x1d0   : > { %v1502_v20 = vadd.f32 %v1444_v57, %v1372_v39  ;;  %v1577_v46 = vpop.f32.mrf.mxu0  ;;  %v1157_v13 = vadd.f32 %v1101_v55, %v3027_v16 }
 0x1d2   : > { %v1632_v17 = vadd.f32 %v1574_v24, %v1502_v20 }
 0x1d4   : > { %v1660_v28 = vadd.f32 %v3265_v63, %v1632_v17 }
 0x1d5   : > { %v1317_v47 = vpop.f32.mrf.mxu2 }
 0x1d6   : > { %1685 = vst.msk [vmem:[%s3282_s12 + $0x38] sm:$0xff] %vm1677_vm4, %v1660_v28  ;;  %v1373_v37 = vadd.f32 %v1317_v47, %v1157_v13  ;;  %v1447_v5 = vpop.f32.mrf.mxu3 }
 0x1d7   : > { %v1104_v45 = vpop.f32.mrf.mxu1 }
 0x1d8   : > { %v1503_v10 = vadd.f32 %v1447_v5, %v1373_v37  ;;  %v1580_v11 = vpop.f32.mrf.mxu0  ;;  %v1158_v1 = vadd.f32 %v1104_v45, %v3042_v35 }
 0x1da   : > { %v1633_v12 = vadd.f32 %v1577_v46, %v1503_v10 }
 0x1dc   : > { %v1661_v26 = vadd.f32 %v3265_v63, %v1633_v12 }
 0x1dd   : > { %v1320_v25 = vpop.f32.mrf.mxu2 }
 0x1de   : > { %1686 = vst.msk [vmem:[%s3282_s12 + $0x40] sm:$0xff] %vm1677_vm4, %v1661_v26  ;;  %v1374_v16 = vadd.f32 %v1320_v25, %v1158_v1  ;;  %v1450_v18 = vpop.f32.mrf.mxu3 }
 0x1df   : > { %v1107_v50 = vpop.f32.mrf.mxu1 }
 0x1e0   : > { %v1504_v59 = vadd.f32 %v1450_v18, %v1374_v16  ;;  %v1583_v9 = vpop.f32.mrf.mxu0  ;;  %v1159_v4 = vadd.f32 %v1107_v50, %v3055_v54 }
 0x1e2   : > { %v1634_v19 = vadd.f32 %v1580_v11, %v1504_v59 }
 0x1e4   : > { %v1662_v22 = vadd.f32 %v3265_v63, %v1634_v19 }
 0x1e5   : > { %v1323_v61 = vpop.f32.mrf.mxu2 }
 0x1e6   : > { %1687 = vst.msk [vmem:[%s3282_s12 + $0x48] sm:$0xff] %vm1677_vm4, %v1662_v22  ;;  %v1375_v35 = vadd.f32 %v1323_v61, %v1159_v4  ;;  %v1453_v33 = vpop.f32.mrf.mxu3 }
 0x1e7   : > { %v1110_v40 = vpop.f32.mrf.mxu1 }
 0x1e8   : > { %v1505_v29 = vadd.f32 %v1453_v33, %v1375_v35  ;;  %v1586_v30 = vpop.f32.mrf.mxu0  ;;  %v1160_v27 = vadd.f32 %v1110_v40, %v3069_v8 }
 0x1ea   : > { %v1635_v0 = vadd.f32 %v1583_v9, %v1505_v29 }
 0x1ec   : > { %v1663_v51 = vadd.f32 %v3265_v63, %v1635_v0 }
 0x1ed   : > { %v1326_v32 = vpop.f32.mrf.mxu2 }
 0x1ee   : > { %1688 = vst.msk [vmem:[%s3282_s12 + $0x50] sm:$0xff] %vm1677_vm4, %v1663_v51  ;;  %v1376_v54 = vadd.f32 %v1326_v32, %v1160_v27  ;;  %v1456_v34 = vpop.f32.mrf.mxu3 }
 0x1ef   : > { %v1113_v38 = vpop.f32.mrf.mxu1 }
 0x1f0   : > { %v1506_v3 = vadd.f32 %v1456_v34, %v1376_v54  ;;  %v1589_v44 = vpop.f32.mrf.mxu0  ;;  %v1161_v36 = vadd.f32 %v1113_v38, %v3083_v41 }
 0x1f2   : > { %v1636_v23 = vadd.f32 %v1586_v30, %v1506_v3 }
 0x1f4   : > { %v1664_v43 = vadd.f32 %v3265_v63, %v1636_v23 }
 0x1f5   : > { %v1329_v24 = vpop.f32.mrf.mxu2 }
 0x1f6   : > { %1689 = vst.msk [vmem:[%s3282_s12 + $0x58] sm:$0xff] %vm1677_vm4, %v1664_v43  ;;  %v1377_v8 = vadd.f32 %v1329_v24, %v1161_v36  ;;  %v1459_v14 = vpop.f32.mrf.mxu3 }
 0x1f7   : > { %v1116_v42 = vpop.f32.mrf.mxu1 }
 0x1f8   : > { %v1507_v6 = vadd.f32 %v1459_v14, %v1377_v8  ;;  %v1592_v21 = vpop.f32.mrf.mxu0  ;;  %v1162_v39 = vadd.f32 %v1116_v42, %v3097_v52 }
 0x1fa   : > { %v1637_v7 = vadd.f32 %v1589_v44, %v1507_v6 }
 0x1fc   : > { %v1665_v57 = vadd.f32 %v3265_v63, %v1637_v7 }
 0x1fd   : > { %v1332_v55 = vpop.f32.mrf.mxu2 }
 0x1fe   : > { %1690 = vst.msk [vmem:[%s3282_s12 + $0x60] sm:$0xff] %vm1677_vm4, %v1665_v57  ;;  %v1378_v41 = vadd.f32 %v1332_v55, %v1162_v39  ;;  %v1462_v20 = vpop.f32.mrf.mxu3 }
 0x1ff   : > { %v1119_v46 = vpop.f32.mrf.mxu1 }
 0x200   : > { %v1508_v17 = vadd.f32 %v1462_v20, %v1378_v41  ;;  %v1595_v13 = vpop.f32.mrf.mxu0  ;;  %v1163_v47 = vadd.f32 %v1119_v46, %v3112_v48 }
 0x202   : > { %v1638_v28 = vadd.f32 %v1592_v21, %v1508_v17 }
 0x204   : > { %v1666_v37 = vadd.f32 %v3265_v63, %v1638_v28 }
 0x205   : > { %v1335_v5 = vpop.f32.mrf.mxu2 }
 0x206   : > { %1691 = vst.msk [vmem:[%s3282_s12 + $0x68] sm:$0xff] %vm1677_vm4, %v1666_v37  ;;  %v1379_v52 = vadd.f32 %v1335_v5, %v1163_v47  ;;  %v1465_v45 = vpop.f32.mrf.mxu3 }
 0x207   : > { %v1122_v10 = vpop.f32.mrf.mxu1 }
 0x208   : > { %v1509_v11 = vadd.f32 %v1465_v45, %v1379_v52  ;;  %v1598_v12 = vpop.f32.mrf.mxu0  ;;  %v1164_v26 = vadd.f32 %v1122_v10, %v3127_v49 }
 0x20a   : > { %v1639_v1 = vadd.f32 %v1595_v13, %v1509_v11 }
 0x20c   : > { %v1667_v25 = vadd.f32 %v3265_v63, %v1639_v1 }
 0x20d   : > { %v1338_v16 = vpop.f32.mrf.mxu2 }
 0x20e   : > { %1692 = vst.msk [vmem:[%s3282_s12 + $0x70] sm:$0xff] %vm1677_vm4, %v1667_v25  ;;  %v1380_v48 = vadd.f32 %v1338_v16, %v1164_v26  ;;  %v1468_v18 = vpop.f32.mrf.mxu3 }
 0x20f   : > { %v1125_v50 = vpop.f32.mrf.mxu1 }
 0x210   : > { %v1510_v59 = vadd.f32 %v1468_v18, %v1380_v48  ;;  %v1601_v9 = vpop.f32.mrf.mxu0  ;;  %v1165_v4 = vadd.f32 %v1125_v50, %v3142_v2 }
 0x212   : > { %v1640_v19 = vadd.f32 %v1598_v12, %v1510_v59 }
 0x214   : > { %v1668_v22 = vadd.f32 %v3265_v63, %v1640_v19 }
 0x215   : > { %v1341_v61 = vpop.f32.mrf.mxu2 }
 0x216   : > { %1693 = vst.msk [vmem:[%s3282_s12 + $0x78] sm:$0xff] %vm1677_vm4, %v1668_v22  ;;  %v1381_v49 = vadd.f32 %v1341_v61, %v1165_v4  ;;  %v1471_v35 = vpop.f32.mrf.mxu3 }
 0x217   : > { %v1128_v33 = vpop.f32.mrf.mxu1 }
 0x218   : > { %v1511_v40 = vadd.f32 %v1471_v35, %v1381_v49  ;;  %v1604_v29 = vpop.f32.mrf.mxu0  ;;  %v1166_v0 = vadd.f32 %v1128_v33, %v3157_v15 }
 0x21a   : > { %v1641_v30 = vadd.f32 %v1601_v9, %v1511_v40 }
 0x21c   : > { %v1669_v27 = vadd.f32 %v3265_v63, %v1641_v30 }
 0x21d   : > { %v1344_v51 = vpop.f32.mrf.mxu2 }
 0x21e   : > { %1694 = vst.msk [vmem:[%s3282_s12 + $0x80] sm:$0xff] %vm1677_vm4, %v1669_v27  ;;  %v1382_v2 = vadd.f32 %v1344_v51, %v1166_v0  ;;  %v1474_v32 = vpop.f32.mrf.mxu3  ;;  %v1796_v0 = vld [vmem:[%s3282_s12 + $0x10] sm:$0xff] (%p2442_p6)  ;;  %v1798_v27 = vld [vmem:[%s3282_s12 + $0x18] sm:$0xff] (%p2442_p6)  ;;  %v1800_v51 = vld [vmem:[%s3282_s12 + $0x20] sm:$0xff] (%p2442_p6) }
 0x21f   : > { %v1131_v54 = vpop.f32.mrf.mxu1  ;;  %1797 = vst [vmem:[%s3451_s9 + $0x10] sm:$0xff] (%p2442_p6), %v1796_v0 }
 0x220   : > { %v1512_v34 = vadd.f32 %v1474_v32, %v1382_v2  ;;  %v1607_v38 = vpop.f32.mrf.mxu0  ;;  %v1167_v44 = vadd.f32 %v1131_v54, %v3172_v56  ;;  %v1802_v2 = vld [vmem:[%s3282_s12 + $0x28] sm:$0xff] (%p2442_p6)  ;;  %1799 = vst [vmem:[%s3451_s9 + $0x30] sm:$0xff] (%p2442_p6), %v1798_v27  ;;  %v1804_v32 = vld [vmem:[%s3282_s12 + $0x30] sm:$0xff] (%p2442_p6)  ;;  %v1806_v54 = vld [vmem:[%s3282_s12 + $0x38] sm:$0xff] (%p2442_p6) }
 0x221   : > { %1801 = vst [vmem:[%s3451_s9 + $0x38] sm:$0xff] (%p2442_p6), %v1800_v51 }
 0x222   : > { %v1642_v3 = vadd.f32 %v1604_v29, %v1512_v34  ;;  %1803 = vst [vmem:[%s3451_s9 + $0x40] sm:$0xff] (%p2442_p6), %v1802_v2  ;;  %v1808_v34 = vld [vmem:[%s3282_s12 + $0x40] sm:$0xff] (%p2442_p6) }
 0x223   : > { %1805 = vst [vmem:[%s3451_s9 + $0x60] sm:$0xff] (%p2442_p6), %v1804_v32 }
 0x224   : > { %v1670_v23 = vadd.f32 %v3265_v63, %v1642_v3  ;;  %1807 = vst [vmem:[%s3451_s9 + $0x68] sm:$0xff] (%p2442_p6), %v1806_v54  ;;  %v1812_v3 = vld [vmem:[%s3282_s12 + $0x50] sm:$0xff] (%p2442_p6) }
 0x225   : > { %v1347_v36 = vpop.f32.mrf.mxu2  ;;  %1809 = vst [vmem:[%s3451_s9 + $0x70] sm:$0xff] (%p2442_p6), %v1808_v34 }
 0x226   : > { %1695 = vst.msk [vmem:[%s3282_s12 + $0x88] sm:$0xff] %vm1677_vm4, %v1670_v23  ;;  %v1383_v15 = vadd.f32 %v1347_v36, %v1167_v44  ;;  %v1477_v43 = vpop.f32.mrf.mxu3  ;;  %v1814_v44 = vld [vmem:[%s3282_s12 + $0x58] sm:$0xff] (%p2442_p6)  ;;  %v1816_v23 = vld [vmem:[%s3282_s12 + $0x60] sm:$0xff] (%p2442_p6)  ;;  %v1818_v36 = vld [vmem:[%s3282_s12 + $0x68] sm:$0xff] (%p2442_p6) }
 0x227   : > { %v1134_v24 = vpop.f32.mrf.mxu1  ;;  %1813 = vst [vmem:[%s3451_s9 + $0x98] sm:$0xff] (%p2442_p6), %v1812_v3 }
 0x228   : > { %v1513_v8 = vadd.f32 %v1477_v43, %v1383_v15  ;;  %v1610_v14 = vpop.f32.mrf.mxu0  ;;  %v1168_v6 = vadd.f32 %v1134_v24, %v3187_v58  ;;  %1815 = vst [vmem:[%s3451_s9 + $0xa0] sm:$0xff] (%p2442_p6), %v1814_v44  ;;  %v1820_v15 = vld [vmem:[%s3282_s12 + $0x70] sm:$0xff] (%p2442_p6)  ;;  %v1822_v43 = vld [vmem:[%s3282_s12 + $0x78] sm:$0xff] (%p2442_p6)  ;;  %v1824_v24 = vld [vmem:[%s3282_s12 + $0x80] sm:$0xff] (%p2442_p6) }
 0x229   : > { %1817 = vst [vmem:[%s3451_s9 + $0xc0] sm:$0xff] (%p2442_p6), %v1816_v23 }
 0x22a   : > { %v1643_v42 = vadd.f32 %v1607_v38, %v1513_v8  ;;  %v1810_v38 = vld [vmem:[%s3282_s12 + $0x48] sm:$0xff] (%p2442_p6)  ;;  %1819 = vst [vmem:[%s3451_s9 + $0xc8] sm:$0xff] (%p2442_p6), %v1818_v36 }
 0x22b   : > { %1811 = vst [vmem:[%s3451_s9 + $0x90] sm:$0xff] (%p2442_p6), %v1810_v38 }
 0x22c   : > { %v1671_v21 = vadd.f32 %v3265_v63, %v1643_v42  ;;  %1821 = vst [vmem:[%s3451_s9 + $0xd0] sm:$0xff] (%p2442_p6), %v1820_v15 }
 0x22d   : > { %v1350_v7 = vpop.f32.mrf.mxu2  ;;  %v1826_v8 = vld [vmem:[%s3282_s12 + $0x88] sm:$0xff] (%p2442_p6)  ;;  %1823 = vst [vmem:[%s3451_s9 + $0xf0] sm:$0xff] (%p2442_p6), %v1822_v43 }
 0x22e   : > { %1696 = vst.msk [vmem:[%s3282_s12 + $0x90] sm:$0xff] %vm1677_vm4, %v1671_v21  ;;  %v1384_v56 = vadd.f32 %v1350_v7, %v1168_v6  ;;  %v1480_v39 = vpop.f32.mrf.mxu3 }
 0x22f   : > { %v1137_v57 = vpop.f32.mrf.mxu1  ;;  %1825 = vst [vmem:[%s3451_s9 + $0xf8] sm:$0xff] (%p2442_p6), %v1824_v24 }
 0x230   : > { %v1514_v55 = vadd.f32 %v1480_v39, %v1384_v56  ;;  %v1613_v41 = vpop.f32.mrf.mxu0  ;;  %v1169_v46 = vadd.f32 %v1137_v57, %v3202_v60  ;;  %1827 = vst [vmem:[%s3451_s9 + $0x100] sm:$0xff] (%p2442_p6), %v1826_v8 }
 0x232   : > { %v1644_v20 = vadd.f32 %v1610_v14, %v1514_v55 }
 0x234   : > { %v1672_v17 = vadd.f32 %v3265_v63, %v1644_v20 }
 0x235   : > { %v1353_v13 = vpop.f32.mrf.mxu2  ;;  %v1828_v14 = vld [vmem:[%s3282_s12 + $0x90] sm:$0xff] (%p2442_p6) }
 0x236   : > { %1697 = vst.msk [vmem:[%s3282_s12 + $0x98] sm:$0xff] %vm1677_vm4, %v1672_v17  ;;  %v1385_v58 = vadd.f32 %v1353_v13, %v1169_v46  ;;  %v1483_v28 = vpop.f32.mrf.mxu3 }
 0x237   : > { %v1140_v47 = vpop.f32.mrf.mxu1  ;;  %1829 = vst [vmem:[%s3451_s9 + $0x120] sm:$0xff] (%p2442_p6), %v1828_v14 }
 0x238   : > { %v1515_v37 = vadd.f32 %v1483_v28, %v1385_v58  ;;  %v1616_v52 = vpop.f32.mrf.mxu0  ;;  %v1170_v45 = vadd.f32 %v1140_v47, %v3217_v62 }
 0x23a   : > { %v1645_v5 = vadd.f32 %v1613_v41, %v1515_v37 }
 0x23c   : > { %v1673_v10 = vadd.f32 %v3265_v63, %v1645_v5 }
 0x23d   : > { %v1356_v11 = vpop.f32.mrf.mxu2  ;;  %v1830_v42 = vld [vmem:[%s3282_s12 + $0x98] sm:$0xff] (%p2442_p6) }
 0x23e   : > { %1698 = vst.msk [vmem:[%s3282_s12 + $0xa0] sm:$0xff] %vm1677_vm4, %v1673_v10  ;;  %v1386_v60 = vadd.f32 %v1356_v11, %v1170_v45  ;;  %v1486_v12 = vpop.f32.mrf.mxu3 }
 0x23f   : > { %v1143_v1 = vpop.f32.mrf.mxu1  ;;  %1831 = vst [vmem:[%s3451_s9 + $0x128] sm:$0xff] (%p2442_p6), %v1830_v42 }
 0x240   : > { %v1516_v26 = vadd.f32 %v1486_v12, %v1386_v60  ;;  %v1171_v16 = vadd.f32 %v1143_v1, %v3232_v31  ;;  %v1619_v50 = vpop.f32.mrf.mxu0 }
 0x242   : > { %v1646_v25 = vadd.f32 %v1616_v52, %v1516_v26 }
 0x244   : > { %v1674_v48 = vadd.f32 %v3265_v63, %v1646_v25 }
 0x245   : > { %v1359_v18 = vpop.f32.mrf.mxu2  ;;  %v1832_v6 = vld [vmem:[%s3282_s12 + $0xa0] sm:$0xff] (%p2442_p6) }
 0x246   : > { %1699 = vst.msk [vmem:[%s3282_s12 + $0xa8] sm:$0xff] %vm1677_vm4, %v1674_v48  ;;  %v1387_v62 = vadd.f32 %v1359_v18, %v1171_v16  ;;  %v1489_v59 = vpop.f32.mrf.mxu3 }
 0x247   : > { %v1146_v19 = vpop.f32.mrf.mxu1  ;;  %1833 = vst [vmem:[%s3451_s9 + $0x130] sm:$0xff] (%p2442_p6), %v1832_v6 }
 0x248   : > { %v1517_v9 = vadd.f32 %v1489_v59, %v1387_v62  ;;  %v1172_v22 = vadd.f32 %v1146_v19, %v3247_v53  ;;  %v1622_v33 = vpop.f32.mrf.mxu0  ;;  %v1792_v53 = vld [vmem:[%s3282_s12] sm:$0xff] (%p2442_p6) }
 0x249   : > { %1793 = vst [vmem:[%s3451_s9] sm:$0xff] (%p2442_p6), %v1792_v53 }
 0x24a   : > { %v1647_v4 = vadd.f32 %v1619_v50, %v1517_v9 }
 0x24c   : > { %v1675_v61 = vadd.f32 %v3265_v63, %v1647_v4 }
 0x24d   : > { %v1362_v49 = vpop.f32.mrf.mxu2  ;;  %v1834_v21 = vld [vmem:[%s3282_s12 + $0xa8] sm:$0xff] (%p2442_p6) }
 0x24e   : > { %1700 = vst.msk [vmem:[%s3282_s12 + $0xb0] sm:$0xff] %vm1677_vm4, %v1675_v61  ;;  %v1388_v31 = vadd.f32 %v1362_v49, %v1172_v22  ;;  %v1492_v35 = vpop.f32.mrf.mxu3 }
 0x24f   : > { %1835 = vst [vmem:[%s3451_s9 + $0x150] sm:$0xff] (%p2442_p6), %v1834_v21 }
 0x250   : > { %v1518_v40 = vadd.f32 %v1492_v35, %v1388_v31 }
 0x252   : > { %v1648_v29 = vadd.f32 %v1622_v33, %v1518_v40  ;;  %1708 = sbr.rel (!%p2442_p6) target bundleno = 607 (0x25f), region = 36 }
 0x254   : > { %v1676_v30 = vadd.f32 %v3265_v63, %v1648_v29  ;;  %v1794_v63 = vld [vmem:[%s3282_s12 + $0x8] sm:$0xff] (%p2442_p6) }
 0x255   : > { %1795 = vst [vmem:[%s3451_s9 + $0x8] sm:$0xff] (%p2442_p6), %v1794_v63  ;;  %v1836_v7 = vld [vmem:[%s3282_s12 + $0xb0] sm:$0xff] (%p2442_p6) }
 0x256   : > { %1701 = vst.msk [vmem:[%s3282_s12 + $0xb8] sm:$0xff] %vm1677_vm4, %v1676_v30 }
 0x257   : > { %1837 = vst [vmem:[%s3451_s9 + $0x158] sm:$0xff] %v1836_v7 }
 0x25d   : > { %v1838_v56 = vld [vmem:[%s3282_s12 + $0xb8] sm:$0xff] }
 0x25e   : > { %1839 = vst [vmem:[%s3451_s9 + $0x160] sm:$0xff] %v1838_v56 }
 0x25f PF: > { %s13_s20 = sadd.s32 1, %s2361_s20   ;;  %s3586_s12 = smov %s2333_s13 }
 0x260   : > { %p10_p13 = scmp.ge.s32.totalorder %s13_s20, 10   ;;  %s3587_s13 = smov %s2456_s5 }
 0x261   : > { %s3588_s14 = smov %s2349_s17  ;;  %s3589_s15 = smov %s2353_s18 }
 0x262   : > { %s3590_s16 = smov %s2357_s19  ;;  %s3591_s17 = smov %s3595_s21 }
 0x263   : > { %s3592_s18 = smov %s3599_s22  ;;  %s3593_s19 = smov %s3603_s24 }
 0x264   :  { %12 = sbr.rel (!%p10_p13) target bundleno = 5 (0x5), region = 114 }

</bundles_post_ra>
